<compile_context>
chip_gen: v7x
topology: tpu7x:2x2x1
jax: 0.10.0
libtpu: 0.0.40
codegen_flags: <defaults>
</compile_context>

<pallas_src>
import functools
import math

import jax
import jax.numpy as jnp
from jax.experimental import pallas as pl
from jax.experimental.pallas import tpu as pltpu


def encoder_layer_kernel(
    x_ref,              # (R, H) f32   R = batch_tile * S
    wqkv_ref, bqkv_ref,  # (H, 3H) cdt, (1, 3H) f32
    wo_ref, bo_ref,      # (H, H) cdt,  (1, H) f32
    g1_ref, be1_ref,     # LayerNorm 1 gamma/beta (1, H) f32
    w1_ref, b1_ref,      # (H, F) cdt,  (1, F) f32
    w2_ref, b2_ref,      # (F, H) cdt,  (1, H) f32
    g2_ref, be2_ref,     # LayerNorm 2 gamma/beta (1, H) f32
    o_ref,               # (R, H) compute dtype
    ctx_ref,             # VMEM scratch (R, H) compute dtype
    *, batch_tile, seq_len, num_heads, head_dim, eps, approx_recip,
):
    f32 = jnp.float32
    cdt = ctx_ref.dtype
    H = num_heads * head_dim

    x_f32 = x_ref[...]                 # (R, H) f32 (exact residual source)
    x = x_f32.astype(cdt)

    # ---- fused Q/K/V projection: one MXU push with N = 3H ------------------
    qkv = (jnp.dot(x, wqkv_ref[...], preferred_element_type=f32)
           + bqkv_ref[0]).astype(cdt)                                # (R, 3H)
    q = qkv[:, 0:H]
    k = qkv[:, H:2 * H]
    v = qkv[:, 2 * H:3 * H]

    scale = 1.0 / math.sqrt(float(head_dim))

    # ---- attention: per (batch, head) scores/softmax; each head's context is
    #      stored straight into the (R, H) scratch at its lane offset so the
    #      output projection below is a single full-K matmul. ----------------
    for b in range(batch_tile):                       # static unroll (tiny)
        r0 = b * seq_len
        for h in range(num_heads):                    # static unroll (tiny)
            lo = h * head_dim
            qh = q[r0:r0 + seq_len, lo:lo + head_dim]       # (S, hd)
            kh = k[r0:r0 + seq_len, lo:lo + head_dim]
            vh = v[r0:r0 + seq_len, lo:lo + head_dim]
            # q @ k^T without materializing a transpose: contract dim 1/1.
            s = jax.lax.dot_general(
                qh, kh, (((1,), (1,)), ((), ())),
                preferred_element_type=f32) * scale             # (S, S) f32
            s = s - jnp.max(s, axis=-1, keepdims=True)
            p = jnp.exp(s)
            denom = jnp.sum(p, axis=-1, keepdims=True)
            if approx_recip:
                p = p * pl.reciprocal(denom, approx=True)       # EUP slot
            else:
                p = p / denom                                   # exact (f32 path)
            ctx = jnp.dot(p.astype(cdt), vh,
                          preferred_element_type=f32)           # (S, hd)
            ctx_ref[r0:r0 + seq_len, lo:lo + head_dim] = ctx.astype(cdt)

    # ---- output projection: ONE (R,H) @ (H,H) matmul, K = H ----------------
    attn = (jnp.dot(ctx_ref[...], wo_ref[...],
                    preferred_element_type=f32) + bo_ref[0])    # (R, H) f32

    # ---- residual + LayerNorm 1 (one-pass f32 statistics) ------------------
    y = x_f32 + attn
    mu = jnp.mean(y, axis=-1, keepdims=True)
    msq = jnp.mean(y * y, axis=-1, keepdims=True)
    var = msq - mu * mu
    y = (y - mu) * jax.lax.rsqrt(var + eps) * g1_ref[0] + be1_ref[0]

    # ---- FeedForward over all rows ------------------------------------------
    ff = jnp.dot(y.astype(cdt), w1_ref[...],
                 preferred_element_type=f32) + b1_ref[0]        # (R, F) f32
    ff = jnp.maximum(ff, 0.0).astype(cdt)
    ff = jnp.dot(ff, w2_ref[...],
                 preferred_element_type=f32) + b2_ref[0]        # (R, H) f32

    # ---- residual + LayerNorm 2 ---------------------------------------------
    z = y + ff
    mu2 = jnp.mean(z, axis=-1, keepdims=True)
    msq2 = jnp.mean(z * z, axis=-1, keepdims=True)
    var2 = msq2 - mu2 * mu2
    z = (z - mu2) * jax.lax.rsqrt(var2 + eps) * g2_ref[0] + be2_ref[0]

    o_ref[...] = z.astype(o_ref.dtype)


def _pick_batch_tile(B, S, rows_target):
    """Largest divisor of B with (a) rows per tile <= rows_target (but >= one
    batch element) and (b) at least 2 grid points when B >= 2 so the grid can
    be sharded across v7x's two TensorCores."""
    best = 1
    for cand in range(1, B + 1):
        if B % cand != 0:
            continue
        if cand * S > max(rows_target, S):
            continue
        if B >= 2 and (B // cand) < 2:
            continue
        best = cand
    return best


def encoder_layer(x, params, *, num_heads, compute_dtype=jnp.bfloat16,
                  rows_target=512):
    """x: (B, S, H) float32.  params: dict of weights (see init_params)."""
    B, S, H = x.shape
    F = params["w1"].shape[1]
    head_dim = H // num_heads

    bt = _pick_batch_tile(B, S, rows_target)
    num_tiles = B // bt
    R = bt * S

    cdt = jnp.dtype(compute_dtype)
    # Activations stay f32 at the boundary (exact residuals, f32 stats); large
    # weights are fed in the MXU-native compute dtype; biases / LN params f32.
    x2d = x.reshape(B * S, H).astype(jnp.float32)
    wqkv = jnp.concatenate(
        [params["wq"], params["wk"], params["wv"]], axis=1).astype(cdt)  # (H,3H)
    bqkv = jnp.concatenate(
        [params["bq"], params["bk"], params["bv"]], axis=1)              # (1,3H)
    wo = params["wo"].astype(cdt)
    w1 = params["w1"].astype(cdt)
    w2 = params["w2"].astype(cdt)

    kernel = functools.partial(
        encoder_layer_kernel,
        batch_tile=bt, seq_len=S, num_heads=num_heads, head_dim=head_dim,
        eps=1e-5, approx_recip=(cdt != jnp.float32),
    )

    # --- generation-aware VMEM budget ----------------------------------------
    isz = cdt.itemsize
    w_bytes = (4 * H * H + 2 * H * F) * isz
    small_bytes = (8 * H + 4 * F) * 4
    io_bytes = R * H * (4 + isz)                     # x (f32) in + out (cdt)
    scratch_bytes = R * H * isz
    inter_bytes = 4 * R * max(3 * H, F) * 4          # qkv / ff intermediates slack
    est = 2 * io_bytes + 2 * w_bytes + scratch_bytes + inter_bytes + 2 * small_bytes
    try:
        vmem_cap = int(pltpu.get_tpu_info().vmem_capacity_bytes)
    except Exception:
        vmem_cap = 64 * 2**20                        # conservative (v7x)
    vmem_limit = int(min(int(0.85 * vmem_cap), max(32 * 2**20, 2 * est)))
    vmem_limit = max(vmem_limit, 16 * 2**20)

    # --- advisory cost estimate for the XLA scheduler ------------------------
    flops = int(2 * B * S * H * (3 * H + H + 2 * F) + 4 * B * S * S * H)
    transcendentals = int(B * num_heads * S * S)
    bytes_accessed = int(B * S * H * (4 + isz)
                         + num_tiles * (w_bytes + small_bytes))
    cost = pl.CostEstimate(flops=flops, transcendentals=transcendentals,
                           bytes_accessed=bytes_accessed)

    args = (x2d,
            wqkv, bqkv, wo, params["bo"],
            params["g1"], params["be1"],
            w1, params["b1"], w2, params["b2"],
            params["g2"], params["be2"])

    def run(single_buffer_weights):
        def wspec(shape):
            # Grid-constant operands: single-buffering buys back VMEM.
            if single_buffer_weights:
                return pl.BlockSpec(shape, lambda b: (0, 0),
                                    pipeline_mode=pl.Buffered(1))
            return pl.BlockSpec(shape, lambda b: (0, 0))

        return pl.pallas_call(
            kernel,
            out_shape=jax.ShapeDtypeStruct((B * S, H), cdt),
            grid_spec=pltpu.PrefetchScalarGridSpec(
                num_scalar_prefetch=0,
                grid=(num_tiles,),
                in_specs=[
                    pl.BlockSpec((R, H), lambda b: (b, 0)),      # x
                    wspec((H, 3 * H)), wspec((1, 3 * H)),        # wqkv, bqkv
                    wspec((H, H)), wspec((1, H)),                # wo, bo
                    wspec((1, H)), wspec((1, H)),                # ln1 gamma/beta
                    wspec((H, F)), wspec((1, F)),                # w1, b1
                    wspec((F, H)), wspec((1, H)),                # w2, b2
                    wspec((1, H)), wspec((1, H)),                # ln2 gamma/beta
                ],
                out_specs=pl.BlockSpec((R, H), lambda b: (b, 0)),
                scratch_shapes=[pltpu.VMEM((R, H), cdt)],        # per-head ctx
            ),
            compiler_params=pltpu.CompilerParams(
                dimension_semantics=("parallel",),
                vmem_limit_bytes=vmem_limit),
            cost_estimate=cost,
        )(*args)

    try:
        out2d = run(True)
    except Exception:
        # Older jax without pipeline_mode / Buffered(1): default double-buffer.
        out2d = run(False)

    return out2d.reshape(B, S, H).astype(jnp.float32)


def init_params(key, hidden_dim, ff_dim):
    """Deterministic synthetic parameters. Linear weights stored (in, out)."""
    ks = jax.random.split(key, 12)

    def lin(kw, kb, din, dout):
        w = jax.random.normal(kw, (din, dout), jnp.float32) * (1.0 / math.sqrt(din))
        b = jax.random.normal(kb, (1, dout), jnp.float32) * 0.02
        return w, b

    wq, bq = lin(ks[0], ks[1], hidden_dim, hidden_dim)
    wk, bk = lin(ks[2], ks[3], hidden_dim, hidden_dim)
    wv, bv = lin(ks[4], ks[5], hidden_dim, hidden_dim)
    wo, bo = lin(ks[6], ks[7], hidden_dim, hidden_dim)
    w1, b1 = lin(ks[8], ks[9], hidden_dim, ff_dim)
    w2, b2 = lin(ks[10], ks[11], ff_dim, hidden_dim)
    return dict(
        wq=wq, bq=bq, wk=wk, bk=bk, wv=wv, bv=bv, wo=wo, bo=bo,
        g1=jnp.ones((1, hidden_dim), jnp.float32),
        be1=jnp.zeros((1, hidden_dim), jnp.float32),
        w1=w1, b1=b1, w2=w2, b2=b2,
        g2=jnp.ones((1, hidden_dim), jnp.float32),
        be2=jnp.zeros((1, hidden_dim), jnp.float32),
    )


# Pure-JAX reference (mirrors the PyTorch forward) for the correctness check.
def encoder_layer_ref(x, p, *, num_heads):
    B, S, H = x.shape
    hd = H // num_heads

    def proj(x, w, b):
        return x @ w + b[0]

    q = proj(x, p["wq"], p["bq"]).reshape(B, S, num_heads, hd).transpose(0, 2, 1, 3)
    k = proj(x, p["wk"], p["bk"]).reshape(B, S, num_heads, hd).transpose(0, 2, 1, 3)
    v = proj(x, p["wv"], p["bv"]).reshape(B, S, num_heads, hd).transpose(0, 2, 1, 3)
    s = jnp.einsum("bhqd,bhkd->bhqk", q, k) / jnp.sqrt(jnp.float32(hd))
    pr = jax.nn.softmax(s, axis=-1)
    a = jnp.einsum("bhqk,bhkd->bhqd", pr, v).transpose(0, 2, 1, 3).reshape(B, S, H)
    a = proj(a, p["wo"], p["bo"])

    def ln(y, g, b):
        mu = y.mean(-1, keepdims=True)
        var = ((y - mu) ** 2).mean(-1, keepdims=True)
        return (y - mu) / jnp.sqrt(var + 1e-5) * g[0] + b[0]

    y = ln(x + a, p["g1"], p["be1"])
    ff = jnp.maximum(proj(y, p["w1"], p["b1"]), 0.0)
    ff = proj(ff, p["w2"], p["b2"])
    return ln(y + ff, p["g2"], p["be2"])


if __name__ == "__main__":
    B, S, H, NH, F = 2, 8, 32, 4, 64
    key = jax.random.PRNGKey(0)
    kx, kp = jax.random.split(key)
    x = jax.random.normal(kx, (B, S, H), jnp.float32)
    params = init_params(kp, H, F)

    ref = encoder_layer_ref(x, params, num_heads=NH)

    # f32 compute path: tight structural correctness check (exact softmax div).
    out_f32 = jax.block_until_ready(
        encoder_layer(x, params, num_heads=NH, compute_dtype=jnp.float32))
    assert out_f32.shape == (B, S, H)
    assert jnp.allclose(out_f32, ref, atol=2e-3, rtol=2e-3)

    # bf16 compute path (default, MXU-native feed): looser tolerance.
    out_bf16 = jax.block_until_ready(
        encoder_layer(x, params, num_heads=NH, compute_dtype=jnp.bfloat16))
    assert out_bf16.shape == (B, S, H)
    assert float(jnp.max(jnp.abs(out_bf16 - ref))) < 0.15

    print("KERNEL_OK")
</pallas_src>

<mosaic_0001>
module attributes {stable_mosaic.version = 11 : i64} {
  func.func @encoder_layer_kernel(%arg0: i32, %arg1: memref<8x32xf32, #tpu.memory_space<vmem>>, %arg2: memref<32x96xf32, #tpu.memory_space<vmem>>, %arg3: memref<1x96xf32, #tpu.memory_space<vmem>>, %arg4: memref<32x32xf32, #tpu.memory_space<vmem>>, %arg5: memref<1x32xf32, #tpu.memory_space<vmem>>, %arg6: memref<1x32xf32, #tpu.memory_space<vmem>>, %arg7: memref<1x32xf32, #tpu.memory_space<vmem>>, %arg8: memref<32x64xf32, #tpu.memory_space<vmem>>, %arg9: memref<1x64xf32, #tpu.memory_space<vmem>>, %arg10: memref<64x32xf32, #tpu.memory_space<vmem>>, %arg11: memref<1x32xf32, #tpu.memory_space<vmem>>, %arg12: memref<1x32xf32, #tpu.memory_space<vmem>>, %arg13: memref<1x32xf32, #tpu.memory_space<vmem>>, %arg14: memref<8x32xf32, #tpu.memory_space<vmem>>, %arg15: memref<8x32xf32, #tpu.memory_space<vmem>>) attributes {dimension_semantics = [#tpu.dimension_semantics<parallel>], iteration_bounds = array<i64: 2>, scalar_prefetch = 0 : i64, scratch_operands = 1 : i64, tpu.core_type = #tpu.core_type<tc>, window_params = [{transform_indices = @transform_0, window_bounds = array<i64: 8, 32>}, {pipeline_mode = #tpu.pipeline_mode<synchronous>, transform_indices = @transform_1, window_bounds = array<i64: 32, 96>}, {pipeline_mode = #tpu.pipeline_mode<synchronous>, transform_indices = @transform_2, window_bounds = array<i64: 1, 96>}, {pipeline_mode = #tpu.pipeline_mode<synchronous>, transform_indices = @transform_3, window_bounds = array<i64: 32, 32>}, {pipeline_mode = #tpu.pipeline_mode<synchronous>, transform_indices = @transform_4, window_bounds = array<i64: 1, 32>}, {pipeline_mode = #tpu.pipeline_mode<synchronous>, transform_indices = @transform_5, window_bounds = array<i64: 1, 32>}, {pipeline_mode = #tpu.pipeline_mode<synchronous>, transform_indices = @transform_6, window_bounds = array<i64: 1, 32>}, {pipeline_mode = #tpu.pipeline_mode<synchronous>, transform_indices = @transform_7, window_bounds = array<i64: 32, 64>}, {pipeline_mode = #tpu.pipeline_mode<synchronous>, transform_indices = @transform_8, window_bounds = array<i64: 1, 64>}, {pipeline_mode = #tpu.pipeline_mode<synchronous>, transform_indices = @transform_9, window_bounds = array<i64: 64, 32>}, {pipeline_mode = #tpu.pipeline_mode<synchronous>, transform_indices = @transform_10, window_bounds = array<i64: 1, 32>}, {pipeline_mode = #tpu.pipeline_mode<synchronous>, transform_indices = @transform_11, window_bounds = array<i64: 1, 32>}, {pipeline_mode = #tpu.pipeline_mode<synchronous>, transform_indices = @transform_12, window_bounds = array<i64: 1, 32>}, {transform_indices = @transform_13, window_bounds = array<i64: 8, 32>}]} {
    %c0 = arith.constant 0 : index
    %c0_0 = arith.constant 0 : index
    %0 = vector.load %arg1[%c0, %c0_0] : memref<8x32xf32, #tpu.memory_space<vmem>>, vector<8x32xf32>
    %c0_1 = arith.constant 0 : index
    %c0_2 = arith.constant 0 : index
    %1 = vector.load %arg2[%c0_1, %c0_2] : memref<32x96xf32, #tpu.memory_space<vmem>>, vector<32x96xf32>
    %cst = arith.constant dense<0.000000e+00> : vector<8x96xf32>
    %2 = tpu.matmul %0, %1, %cst {dimension_numbers = #tpu.dot_dimension_numbers<[1], [0], [0], [1], [0, 0, 1, 1], [], []>} : vector<8x32xf32>, vector<32x96xf32>, vector<8x96xf32> -> vector<8x96xf32>
    %c0_3 = arith.constant 0 : index
    %c0_4 = arith.constant 0 : index
    %3 = vector.load %arg3[%c0_3, %c0_4] : memref<1x96xf32, #tpu.memory_space<vmem>>, vector<1x96xf32>
    %4 = vector.shape_cast %3 : vector<1x96xf32> to vector<96xf32>
    %5 = vector.shape_cast %4 : vector<96xf32> to vector<1x96xf32>
    %6 = vector.broadcast %5 : vector<1x96xf32> to vector<8x96xf32>
    %7 = arith.addf %2, %6 : vector<8x96xf32>
    %8 = vector.extract_strided_slice %7 {offsets = [0, 0], sizes = [8, 32], strides = [1, 1]} : vector<8x96xf32> to vector<8x32xf32>
    %9 = vector.extract_strided_slice %7 {offsets = [0, 32], sizes = [8, 32], strides = [1, 1]} : vector<8x96xf32> to vector<8x32xf32>
    %10 = vector.extract_strided_slice %7 {offsets = [0, 64], sizes = [8, 32], strides = [1, 1]} : vector<8x96xf32> to vector<8x32xf32>
    %11 = vector.extract_strided_slice %8 {offsets = [0, 0], sizes = [8, 8], strides = [1, 1]} : vector<8x32xf32> to vector<8x8xf32>
    %12 = vector.extract_strided_slice %9 {offsets = [0, 0], sizes = [8, 8], strides = [1, 1]} : vector<8x32xf32> to vector<8x8xf32>
    %13 = vector.extract_strided_slice %10 {offsets = [0, 0], sizes = [8, 8], strides = [1, 1]} : vector<8x32xf32> to vector<8x8xf32>
    %cst_5 = arith.constant dense<0.000000e+00> : vector<8x8xf32>
    %14 = tpu.matmul %11, %12, %cst_5 {dimension_numbers = #tpu.dot_dimension_numbers<[1], [1], [0], [0], [0, 0, 1, 0], [], []>} : vector<8x8xf32>, vector<8x8xf32>, vector<8x8xf32> -> vector<8x8xf32>
    %cst_6 = arith.constant 0.353553385 : f32
    %15 = vector.broadcast %cst_6 : f32 to vector<8x8xf32>
    %16 = arith.mulf %14, %15 : vector<8x8xf32>
    %cst_7 = arith.constant dense<0xFF800000> : vector<8xf32>
    %17 = vector.multi_reduction <maximumf>, %16, %cst_7 [1] : vector<8x8xf32> to vector<8xf32>
    %18 = vector.shape_cast %17 : vector<8xf32> to vector<8x1xf32>
    %19 = vector.broadcast %18 : vector<8x1xf32> to vector<8x8xf32>
    %20 = arith.subf %16, %19 : vector<8x8xf32>
    %21 = math.exp %20 : vector<8x8xf32>
    %cst_8 = arith.constant dense<0.000000e+00> : vector<8xf32>
    %22 = vector.multi_reduction <add>, %21, %cst_8 [1] : vector<8x8xf32> to vector<8xf32>
    %23 = vector.shape_cast %22 : vector<8xf32> to vector<8x1xf32>
    %24 = vector.broadcast %23 : vector<8x1xf32> to vector<8x8xf32>
    %25 = arith.divf %21, %24 : vector<8x8xf32>
    %cst_9 = arith.constant dense<0.000000e+00> : vector<8x8xf32>
    %26 = tpu.matmul %25, %13, %cst_9 {dimension_numbers = #tpu.dot_dimension_numbers<[1], [0], [0], [1], [0, 0, 1, 1], [], []>} : vector<8x8xf32>, vector<8x8xf32>, vector<8x8xf32> -> vector<8x8xf32>
    %c0_10 = arith.constant 0 : index
    %c0_11 = arith.constant 0 : index
    %27 = vector.load %arg15[%c0_10, %c0_11] : memref<8x32xf32, #tpu.memory_space<vmem>>, vector<8x8xf32>
    tpu.vector_store %arg15[%c0_10, %c0_11], %26 {strides = array<i32>} : memref<8x32xf32, #tpu.memory_space<vmem>>, vector<8x8xf32>,
    %28 = vector.extract_strided_slice %8 {offsets = [0, 8], sizes = [8, 8], strides = [1, 1]} : vector<8x32xf32> to vector<8x8xf32>
    %29 = vector.extract_strided_slice %9 {offsets = [0, 8], sizes = [8, 8], strides = [1, 1]} : vector<8x32xf32> to vector<8x8xf32>
    %30 = vector.extract_strided_slice %10 {offsets = [0, 8], sizes = [8, 8], strides = [1, 1]} : vector<8x32xf32> to vector<8x8xf32>
    %cst_12 = arith.constant dense<0.000000e+00> : vector<8x8xf32>
    %31 = tpu.matmul %28, %29, %cst_12 {dimension_numbers = #tpu.dot_dimension_numbers<[1], [1], [0], [0], [0, 0, 1, 0], [], []>} : vector<8x8xf32>, vector<8x8xf32>, vector<8x8xf32> -> vector<8x8xf32>
    %cst_13 = arith.constant 0.353553385 : f32
    %32 = vector.broadcast %cst_13 : f32 to vector<8x8xf32>
    %33 = arith.mulf %31, %32 : vector<8x8xf32>
    %cst_14 = arith.constant dense<0xFF800000> : vector<8xf32>
    %34 = vector.multi_reduction <maximumf>, %33, %cst_14 [1] : vector<8x8xf32> to vector<8xf32>
    %35 = vector.shape_cast %34 : vector<8xf32> to vector<8x1xf32>
    %36 = vector.broadcast %35 : vector<8x1xf32> to vector<8x8xf32>
    %37 = arith.subf %33, %36 : vector<8x8xf32>
    %38 = math.exp %37 : vector<8x8xf32>
    %cst_15 = arith.constant dense<0.000000e+00> : vector<8xf32>
    %39 = vector.multi_reduction <add>, %38, %cst_15 [1] : vector<8x8xf32> to vector<8xf32>
    %40 = vector.shape_cast %39 : vector<8xf32> to vector<8x1xf32>
    %41 = vector.broadcast %40 : vector<8x1xf32> to vector<8x8xf32>
    %42 = arith.divf %38, %41 : vector<8x8xf32>
    %cst_16 = arith.constant dense<0.000000e+00> : vector<8x8xf32>
    %43 = tpu.matmul %42, %30, %cst_16 {dimension_numbers = #tpu.dot_dimension_numbers<[1], [0], [0], [1], [0, 0, 1, 1], [], []>} : vector<8x8xf32>, vector<8x8xf32>, vector<8x8xf32> -> vector<8x8xf32>
    %c0_17 = arith.constant 0 : index
    %c8 = arith.constant 8 : index
    %44 = vector.load %arg15[%c0_17, %c8] : memref<8x32xf32, #tpu.memory_space<vmem>>, vector<8x8xf32>
    tpu.vector_store %arg15[%c0_17, %c8], %43 {strides = array<i32>} : memref<8x32xf32, #tpu.memory_space<vmem>>, vector<8x8xf32>,
    %45 = vector.extract_strided_slice %8 {offsets = [0, 16], sizes = [8, 8], strides = [1, 1]} : vector<8x32xf32> to vector<8x8xf32>
    %46 = vector.extract_strided_slice %9 {offsets = [0, 16], sizes = [8, 8], strides = [1, 1]} : vector<8x32xf32> to vector<8x8xf32>
    %47 = vector.extract_strided_slice %10 {offsets = [0, 16], sizes = [8, 8], strides = [1, 1]} : vector<8x32xf32> to vector<8x8xf32>
    %cst_18 = arith.constant dense<0.000000e+00> : vector<8x8xf32>
    %48 = tpu.matmul %45, %46, %cst_18 {dimension_numbers = #tpu.dot_dimension_numbers<[1], [1], [0], [0], [0, 0, 1, 0], [], []>} : vector<8x8xf32>, vector<8x8xf32>, vector<8x8xf32> -> vector<8x8xf32>
    %cst_19 = arith.constant 0.353553385 : f32
    %49 = vector.broadcast %cst_19 : f32 to vector<8x8xf32>
    %50 = arith.mulf %48, %49 : vector<8x8xf32>
    %cst_20 = arith.constant dense<0xFF800000> : vector<8xf32>
    %51 = vector.multi_reduction <maximumf>, %50, %cst_20 [1] : vector<8x8xf32> to vector<8xf32>
    %52 = vector.shape_cast %51 : vector<8xf32> to vector<8x1xf32>
    %53 = vector.broadcast %52 : vector<8x1xf32> to vector<8x8xf32>
    %54 = arith.subf %50, %53 : vector<8x8xf32>
    %55 = math.exp %54 : vector<8x8xf32>
    %cst_21 = arith.constant dense<0.000000e+00> : vector<8xf32>
    %56 = vector.multi_reduction <add>, %55, %cst_21 [1] : vector<8x8xf32> to vector<8xf32>
    %57 = vector.shape_cast %56 : vector<8xf32> to vector<8x1xf32>
    %58 = vector.broadcast %57 : vector<8x1xf32> to vector<8x8xf32>
    %59 = arith.divf %55, %58 : vector<8x8xf32>
    %cst_22 = arith.constant dense<0.000000e+00> : vector<8x8xf32>
    %60 = tpu.matmul %59, %47, %cst_22 {dimension_numbers = #tpu.dot_dimension_numbers<[1], [0], [0], [1], [0, 0, 1, 1], [], []>} : vector<8x8xf32>, vector<8x8xf32>, vector<8x8xf32> -> vector<8x8xf32>
    %c0_23 = arith.constant 0 : index
    %c16 = arith.constant 16 : index
    %61 = vector.load %arg15[%c0_23, %c16] : memref<8x32xf32, #tpu.memory_space<vmem>>, vector<8x8xf32>
    tpu.vector_store %arg15[%c0_23, %c16], %60 {strides = array<i32>} : memref<8x32xf32, #tpu.memory_space<vmem>>, vector<8x8xf32>,
    %62 = vector.extract_strided_slice %8 {offsets = [0, 24], sizes = [8, 8], strides = [1, 1]} : vector<8x32xf32> to vector<8x8xf32>
    %63 = vector.extract_strided_slice %9 {offsets = [0, 24], sizes = [8, 8], strides = [1, 1]} : vector<8x32xf32> to vector<8x8xf32>
    %64 = vector.extract_strided_slice %10 {offsets = [0, 24], sizes = [8, 8], strides = [1, 1]} : vector<8x32xf32> to vector<8x8xf32>
    %cst_24 = arith.constant dense<0.000000e+00> : vector<8x8xf32>
    %65 = tpu.matmul %62, %63, %cst_24 {dimension_numbers = #tpu.dot_dimension_numbers<[1], [1], [0], [0], [0, 0, 1, 0], [], []>} : vector<8x8xf32>, vector<8x8xf32>, vector<8x8xf32> -> vector<8x8xf32>
    %cst_25 = arith.constant 0.353553385 : f32
    %66 = vector.broadcast %cst_25 : f32 to vector<8x8xf32>
    %67 = arith.mulf %65, %66 : vector<8x8xf32>
    %cst_26 = arith.constant dense<0xFF800000> : vector<8xf32>
    %68 = vector.multi_reduction <maximumf>, %67, %cst_26 [1] : vector<8x8xf32> to vector<8xf32>
    %69 = vector.shape_cast %68 : vector<8xf32> to vector<8x1xf32>
    %70 = vector.broadcast %69 : vector<8x1xf32> to vector<8x8xf32>
    %71 = arith.subf %67, %70 : vector<8x8xf32>
    %72 = math.exp %71 : vector<8x8xf32>
    %cst_27 = arith.constant dense<0.000000e+00> : vector<8xf32>
    %73 = vector.multi_reduction <add>, %72, %cst_27 [1] : vector<8x8xf32> to vector<8xf32>
    %74 = vector.shape_cast %73 : vector<8xf32> to vector<8x1xf32>
    %75 = vector.broadcast %74 : vector<8x1xf32> to vector<8x8xf32>
    %76 = arith.divf %72, %75 : vector<8x8xf32>
    %cst_28 = arith.constant dense<0.000000e+00> : vector<8x8xf32>
    %77 = tpu.matmul %76, %64, %cst_28 {dimension_numbers = #tpu.dot_dimension_numbers<[1], [0], [0], [1], [0, 0, 1, 1], [], []>} : vector<8x8xf32>, vector<8x8xf32>, vector<8x8xf32> -> vector<8x8xf32>
    %c0_29 = arith.constant 0 : index
    %c24 = arith.constant 24 : index
    %78 = vector.load %arg15[%c0_29, %c24] : memref<8x32xf32, #tpu.memory_space<vmem>>, vector<8x8xf32>
    tpu.vector_store %arg15[%c0_29, %c24], %77 {strides = array<i32>} : memref<8x32xf32, #tpu.memory_space<vmem>>, vector<8x8xf32>,
    %c0_30 = arith.constant 0 : index
    %c0_31 = arith.constant 0 : index
    %79 = vector.load %arg15[%c0_30, %c0_31] : memref<8x32xf32, #tpu.memory_space<vmem>>, vector<8x32xf32>
    %c0_32 = arith.constant 0 : index
    %c0_33 = arith.constant 0 : index
    %80 = vector.load %arg4[%c0_32, %c0_33] : memref<32x32xf32, #tpu.memory_space<vmem>>, vector<32x32xf32>
    %cst_34 = arith.constant dense<0.000000e+00> : vector<8x32xf32>
    %81 = tpu.matmul %79, %80, %cst_34 {dimension_numbers = #tpu.dot_dimension_numbers<[1], [0], [0], [1], [0, 0, 1, 1], [], []>} : vector<8x32xf32>, vector<32x32xf32>, vector<8x32xf32> -> vector<8x32xf32>
    %c0_35 = arith.constant 0 : index
    %c0_36 = arith.constant 0 : index
    %82 = vector.load %arg5[%c0_35, %c0_36] : memref<1x32xf32, #tpu.memory_space<vmem>>, vector<1x32xf32>
    %83 = vector.shape_cast %82 : vector<1x32xf32> to vector<32xf32>
    %84 = vector.shape_cast %83 : vector<32xf32> to vector<1x32xf32>
    %85 = vector.broadcast %84 : vector<1x32xf32> to vector<8x32xf32>
    %86 = arith.addf %81, %85 : vector<8x32xf32>
    %87 = arith.addf %0, %86 : vector<8x32xf32>
    %cst_37 = arith.constant dense<0.000000e+00> : vector<8xf32>
    %88 = vector.multi_reduction <add>, %87, %cst_37 [1] : vector<8x32xf32> to vector<8xf32>
    %89 = vector.shape_cast %88 : vector<8xf32> to vector<8x1xf32>
    %cst_38 = arith.constant 3.200000e+01 : f32
    %90 = vector.broadcast %cst_38 : f32 to vector<8x1xf32>
    %91 = arith.divf %89, %90 : vector<8x1xf32>
    %92 = arith.mulf %87, %87 : vector<8x32xf32>
    %cst_39 = arith.constant dense<0.000000e+00> : vector<8xf32>
    %93 = vector.multi_reduction <add>, %92, %cst_39 [1] : vector<8x32xf32> to vector<8xf32>
    %94 = vector.shape_cast %93 : vector<8xf32> to vector<8x1xf32>
    %cst_40 = arith.constant 3.200000e+01 : f32
    %95 = vector.broadcast %cst_40 : f32 to vector<8x1xf32>
    %96 = arith.divf %94, %95 : vector<8x1xf32>
    %97 = arith.mulf %91, %91 : vector<8x1xf32>
    %98 = arith.subf %96, %97 : vector<8x1xf32>
    %99 = vector.broadcast %91 : vector<8x1xf32> to vector<8x32xf32>
    %100 = arith.subf %87, %99 : vector<8x32xf32>
    %cst_41 = arith.constant 9.99999974E-6 : f32
    %101 = vector.broadcast %cst_41 : f32 to vector<8x1xf32>
    %102 = arith.addf %98, %101 : vector<8x1xf32>
    %103 = math.rsqrt %102 : vector<8x1xf32>
    %104 = vector.broadcast %103 : vector<8x1xf32> to vector<8x32xf32>
    %105 = arith.mulf %100, %104 : vector<8x32xf32>
    %c0_42 = arith.constant 0 : index
    %c0_43 = arith.constant 0 : index
    %106 = vector.load %arg6[%c0_42, %c0_43] : memref<1x32xf32, #tpu.memory_space<vmem>>, vector<1x32xf32>
    %107 = vector.shape_cast %106 : vector<1x32xf32> to vector<32xf32>
    %108 = vector.shape_cast %107 : vector<32xf32> to vector<1x32xf32>
    %109 = vector.broadcast %108 : vector<1x32xf32> to vector<8x32xf32>
    %110 = arith.mulf %105, %109 : vector<8x32xf32>
    %c0_44 = arith.constant 0 : index
    %c0_45 = arith.constant 0 : index
    %111 = vector.load %arg7[%c0_44, %c0_45] : memref<1x32xf32, #tpu.memory_space<vmem>>, vector<1x32xf32>
    %112 = vector.shape_cast %111 : vector<1x32xf32> to vector<32xf32>
    %113 = vector.shape_cast %112 : vector<32xf32> to vector<1x32xf32>
    %114 = vector.broadcast %113 : vector<1x32xf32> to vector<8x32xf32>
    %115 = arith.addf %110, %114 : vector<8x32xf32>
    %c0_46 = arith.constant 0 : index
    %c0_47 = arith.constant 0 : index
    %116 = vector.load %arg8[%c0_46, %c0_47] : memref<32x64xf32, #tpu.memory_space<vmem>>, vector<32x64xf32>
    %cst_48 = arith.constant dense<0.000000e+00> : vector<8x64xf32>
    %117 = tpu.matmul %115, %116, %cst_48 {dimension_numbers = #tpu.dot_dimension_numbers<[1], [0], [0], [1], [0, 0, 1, 1], [], []>} : vector<8x32xf32>, vector<32x64xf32>, vector<8x64xf32> -> vector<8x64xf32>
    %c0_49 = arith.constant 0 : index
    %c0_50 = arith.constant 0 : index
    %118 = vector.load %arg9[%c0_49, %c0_50] : memref<1x64xf32, #tpu.memory_space<vmem>>, vector<1x64xf32>
    %119 = vector.shape_cast %118 : vector<1x64xf32> to vector<64xf32>
    %120 = vector.shape_cast %119 : vector<64xf32> to vector<1x64xf32>
    %121 = vector.broadcast %120 : vector<1x64xf32> to vector<8x64xf32>
    %122 = arith.addf %117, %121 : vector<8x64xf32>
    %cst_51 = arith.constant 0.000000e+00 : f32
    %123 = vector.broadcast %cst_51 : f32 to vector<8x64xf32>
    %124 = arith.maximumf %122, %123 : vector<8x64xf32>
    %c0_52 = arith.constant 0 : index
    %c0_53 = arith.constant 0 : index
    %125 = vector.load %arg10[%c0_52, %c0_53] : memref<64x32xf32, #tpu.memory_space<vmem>>, vector<64x32xf32>
    %cst_54 = arith.constant dense<0.000000e+00> : vector<8x32xf32>
    %126 = tpu.matmul %124, %125, %cst_54 {dimension_numbers = #tpu.dot_dimension_numbers<[1], [0], [0], [1], [0, 0, 1, 1], [], []>} : vector<8x64xf32>, vector<64x32xf32>, vector<8x32xf32> -> vector<8x32xf32>
    %c0_55 = arith.constant 0 : index
    %c0_56 = arith.constant 0 : index
    %127 = vector.load %arg11[%c0_55, %c0_56] : memref<1x32xf32, #tpu.memory_space<vmem>>, vector<1x32xf32>
    %128 = vector.shape_cast %127 : vector<1x32xf32> to vector<32xf32>
    %129 = vector.shape_cast %128 : vector<32xf32> to vector<1x32xf32>
    %130 = vector.broadcast %129 : vector<1x32xf32> to vector<8x32xf32>
    %131 = arith.addf %126, %130 : vector<8x32xf32>
    %132 = arith.addf %115, %131 : vector<8x32xf32>
    %cst_57 = arith.constant dense<0.000000e+00> : vector<8xf32>
    %133 = vector.multi_reduction <add>, %132, %cst_57 [1] : vector<8x32xf32> to vector<8xf32>
    %134 = vector.shape_cast %133 : vector<8xf32> to vector<8x1xf32>
    %cst_58 = arith.constant 3.200000e+01 : f32
    %135 = vector.broadcast %cst_58 : f32 to vector<8x1xf32>
    %136 = arith.divf %134, %135 : vector<8x1xf32>
    %137 = arith.mulf %132, %132 : vector<8x32xf32>
    %cst_59 = arith.constant dense<0.000000e+00> : vector<8xf32>
    %138 = vector.multi_reduction <add>, %137, %cst_59 [1] : vector<8x32xf32> to vector<8xf32>
    %139 = vector.shape_cast %138 : vector<8xf32> to vector<8x1xf32>
    %cst_60 = arith.constant 3.200000e+01 : f32
    %140 = vector.broadcast %cst_60 : f32 to vector<8x1xf32>
    %141 = arith.divf %139, %140 : vector<8x1xf32>
    %142 = arith.mulf %136, %136 : vector<8x1xf32>
    %143 = arith.subf %141, %142 : vector<8x1xf32>
    %144 = vector.broadcast %136 : vector<8x1xf32> to vector<8x32xf32>
    %145 = arith.subf %132, %144 : vector<8x32xf32>
    %cst_61 = arith.constant 9.99999974E-6 : f32
    %146 = vector.broadcast %cst_61 : f32 to vector<8x1xf32>
    %147 = arith.addf %143, %146 : vector<8x1xf32>
    %148 = math.rsqrt %147 : vector<8x1xf32>
    %149 = vector.broadcast %148 : vector<8x1xf32> to vector<8x32xf32>
    %150 = arith.mulf %145, %149 : vector<8x32xf32>
    %c0_62 = arith.constant 0 : index
    %c0_63 = arith.constant 0 : index
    %151 = vector.load %arg12[%c0_62, %c0_63] : memref<1x32xf32, #tpu.memory_space<vmem>>, vector<1x32xf32>
    %152 = vector.shape_cast %151 : vector<1x32xf32> to vector<32xf32>
    %153 = vector.shape_cast %152 : vector<32xf32> to vector<1x32xf32>
    %154 = vector.broadcast %153 : vector<1x32xf32> to vector<8x32xf32>
    %155 = arith.mulf %150, %154 : vector<8x32xf32>
    %c0_64 = arith.constant 0 : index
    %c0_65 = arith.constant 0 : index
    %156 = vector.load %arg13[%c0_64, %c0_65] : memref<1x32xf32, #tpu.memory_space<vmem>>, vector<1x32xf32>
    %157 = vector.shape_cast %156 : vector<1x32xf32> to vector<32xf32>
    %158 = vector.shape_cast %157 : vector<32xf32> to vector<1x32xf32>
    %159 = vector.broadcast %158 : vector<1x32xf32> to vector<8x32xf32>
    %160 = arith.addf %155, %159 : vector<8x32xf32>
    %c0_66 = arith.constant 0 : index
    %c0_67 = arith.constant 0 : index
    %161 = vector.load %arg14[%c0_66, %c0_67] : memref<8x32xf32, #tpu.memory_space<vmem>>, vector<8x32xf32>
    tpu.vector_store %arg14[%c0_66, %c0_67], %160 {strides = array<i32>} : memref<8x32xf32, #tpu.memory_space<vmem>>, vector<8x32xf32>,
    return
  }
  func.func @transform_0(%arg0: i32) -> (i32, i32) {
    %c0_i32 = arith.constant 0 : i32
    %c0_i32_0 = arith.constant 0 : i32
    return %arg0, %c0_i32 : i32, i32
  }
  func.func @transform_1(%arg0: i32) -> (i32, i32) {
    %c0_i32 = arith.constant 0 : i32
    %c0_i32_0 = arith.constant 0 : i32
    %c0_i32_1 = arith.constant 0 : i32
    return %c0_i32, %c0_i32_0 : i32, i32
  }
  func.func @transform_2(%arg0: i32) -> (i32, i32) {
    %c0_i32 = arith.constant 0 : i32
    %c0_i32_0 = arith.constant 0 : i32
    %c0_i32_1 = arith.constant 0 : i32
    return %c0_i32, %c0_i32_0 : i32, i32
  }
  func.func @transform_3(%arg0: i32) -> (i32, i32) {
    %c0_i32 = arith.constant 0 : i32
    %c0_i32_0 = arith.constant 0 : i32
    %c0_i32_1 = arith.constant 0 : i32
    return %c0_i32, %c0_i32_0 : i32, i32
  }
  func.func @transform_4(%arg0: i32) -> (i32, i32) {
    %c0_i32 = arith.constant 0 : i32
    %c0_i32_0 = arith.constant 0 : i32
    %c0_i32_1 = arith.constant 0 : i32
    return %c0_i32, %c0_i32_0 : i32, i32
  }
  func.func @transform_5(%arg0: i32) -> (i32, i32) {
    %c0_i32 = arith.constant 0 : i32
    %c0_i32_0 = arith.constant 0 : i32
    %c0_i32_1 = arith.constant 0 : i32
    return %c0_i32, %c0_i32_0 : i32, i32
  }
  func.func @transform_6(%arg0: i32) -> (i32, i32) {
    %c0_i32 = arith.constant 0 : i32
    %c0_i32_0 = arith.constant 0 : i32
    %c0_i32_1 = arith.constant 0 : i32
    return %c0_i32, %c0_i32_0 : i32, i32
  }
  func.func @transform_7(%arg0: i32) -> (i32, i32) {
    %c0_i32 = arith.constant 0 : i32
    %c0_i32_0 = arith.constant 0 : i32
    %c0_i32_1 = arith.constant 0 : i32
    return %c0_i32, %c0_i32_0 : i32, i32
  }
  func.func @transform_8(%arg0: i32) -> (i32, i32) {
    %c0_i32 = arith.constant 0 : i32
    %c0_i32_0 = arith.constant 0 : i32
    %c0_i32_1 = arith.constant 0 : i32
    return %c0_i32, %c0_i32_0 : i32, i32
  }
  func.func @transform_9(%arg0: i32) -> (i32, i32) {
    %c0_i32 = arith.constant 0 : i32
    %c0_i32_0 = arith.constant 0 : i32
    %c0_i32_1 = arith.constant 0 : i32
    return %c0_i32, %c0_i32_0 : i32, i32
  }
  func.func @transform_10(%arg0: i32) -> (i32, i32) {
    %c0_i32 = arith.constant 0 : i32
    %c0_i32_0 = arith.constant 0 : i32
    %c0_i32_1 = arith.constant 0 : i32
    return %c0_i32, %c0_i32_0 : i32, i32
  }
  func.func @transform_11(%arg0: i32) -> (i32, i32) {
    %c0_i32 = arith.constant 0 : i32
    %c0_i32_0 = arith.constant 0 : i32
    %c0_i32_1 = arith.constant 0 : i32
    return %c0_i32, %c0_i32_0 : i32, i32
  }
  func.func @transform_12(%arg0: i32) -> (i32, i32) {
    %c0_i32 = arith.constant 0 : i32
    %c0_i32_0 = arith.constant 0 : i32
    %c0_i32_1 = arith.constant 0 : i32
    return %c0_i32, %c0_i32_0 : i32, i32
  }
  func.func @transform_13(%arg0: i32) -> (i32, i32) {
    %c0_i32 = arith.constant 0 : i32
    %c0_i32_0 = arith.constant 0 : i32
    return %arg0, %c0_i32 : i32, i32
  }
}

module attributes {stable_mosaic.version = 11 : i64} {
  func.func @encoder_layer_kernel(%arg0: i32, %arg1: memref<8x32xf32, #tpu.memory_space<vmem>>, %arg2: memref<32x96xf32, #tpu.memory_space<vmem>>, %arg3: memref<1x96xf32, #tpu.memory_space<vmem>>, %arg4: memref<32x32xf32, #tpu.memory_space<vmem>>, %arg5: memref<1x32xf32, #tpu.memory_space<vmem>>, %arg6: memref<1x32xf32, #tpu.memory_space<vmem>>, %arg7: memref<1x32xf32, #tpu.memory_space<vmem>>, %arg8: memref<32x64xf32, #tpu.memory_space<vmem>>, %arg9: memref<1x64xf32, #tpu.memory_space<vmem>>, %arg10: memref<64x32xf32, #tpu.memory_space<vmem>>, %arg11: memref<1x32xf32, #tpu.memory_space<vmem>>, %arg12: memref<1x32xf32, #tpu.memory_space<vmem>>, %arg13: memref<1x32xf32, #tpu.memory_space<vmem>>, %arg14: memref<8x32xf32, #tpu.memory_space<vmem>>, %arg15: memref<8x32xf32, #tpu.memory_space<vmem>>) attributes {dimension_semantics = [#tpu.dimension_semantics<parallel>], iteration_bounds = array<i64: 2>, scalar_prefetch = 0 : i64, scratch_operands = 1 : i64, tpu.core_type = #tpu.core_type<tc>, window_params = [{transform_indices = @transform_0, window_bounds = array<i64: 8, 32>}, {pipeline_mode = #tpu.pipeline_mode<synchronous>, transform_indices = @transform_1, window_bounds = array<i64: 32, 96>}, {pipeline_mode = #tpu.pipeline_mode<synchronous>, transform_indices = @transform_2, window_bounds = array<i64: 1, 96>}, {pipeline_mode = #tpu.pipeline_mode<synchronous>, transform_indices = @transform_3, window_bounds = array<i64: 32, 32>}, {pipeline_mode = #tpu.pipeline_mode<synchronous>, transform_indices = @transform_4, window_bounds = array<i64: 1, 32>}, {pipeline_mode = #tpu.pipeline_mode<synchronous>, transform_indices = @transform_5, window_bounds = array<i64: 1, 32>}, {pipeline_mode = #tpu.pipeline_mode<synchronous>, transform_indices = @transform_6, window_bounds = array<i64: 1, 32>}, {pipeline_mode = #tpu.pipeline_mode<synchronous>, transform_indices = @transform_7, window_bounds = array<i64: 32, 64>}, {pipeline_mode = #tpu.pipeline_mode<synchronous>, transform_indices = @transform_8, window_bounds = array<i64: 1, 64>}, {pipeline_mode = #tpu.pipeline_mode<synchronous>, transform_indices = @transform_9, window_bounds = array<i64: 64, 32>}, {pipeline_mode = #tpu.pipeline_mode<synchronous>, transform_indices = @transform_10, window_bounds = array<i64: 1, 32>}, {pipeline_mode = #tpu.pipeline_mode<synchronous>, transform_indices = @transform_11, window_bounds = array<i64: 1, 32>}, {pipeline_mode = #tpu.pipeline_mode<synchronous>, transform_indices = @transform_12, window_bounds = array<i64: 1, 32>}, {transform_indices = @transform_13, window_bounds = array<i64: 8, 32>}]} {
    %c0 = arith.constant 0 : index
    %c0_0 = arith.constant 0 : index
    %0 = vector.load %arg1[%c0, %c0_0] : memref<8x32xf32, #tpu.memory_space<vmem>>, vector<8x32xf32>
    %c0_1 = arith.constant 0 : index
    %c0_2 = arith.constant 0 : index
    %1 = vector.load %arg2[%c0_1, %c0_2] : memref<32x96xf32, #tpu.memory_space<vmem>>, vector<32x96xf32>
    %cst = arith.constant dense<0.000000e+00> : vector<8x96xf32>
    %2 = tpu.matmul %0, %1, %cst {dimension_numbers = #tpu.dot_dimension_numbers<[1], [0], [0], [1], [0, 0, 1, 1], [], []>} : vector<8x32xf32>, vector<32x96xf32>, vector<8x96xf32> -> vector<8x96xf32>
    %c0_3 = arith.constant 0 : index
    %c0_4 = arith.constant 0 : index
    %3 = vector.load %arg3[%c0_3, %c0_4] : memref<1x96xf32, #tpu.memory_space<vmem>>, vector<1x96xf32>
    %4 = vector.shape_cast %3 : vector<1x96xf32> to vector<96xf32>
    %5 = vector.shape_cast %4 : vector<96xf32> to vector<1x96xf32>
    %6 = vector.broadcast %5 : vector<1x96xf32> to vector<8x96xf32>
    %7 = arith.addf %2, %6 : vector<8x96xf32>
    %8 = vector.extract_strided_slice %7 {offsets = [0, 0], sizes = [8, 32], strides = [1, 1]} : vector<8x96xf32> to vector<8x32xf32>
    %9 = vector.extract_strided_slice %7 {offsets = [0, 32], sizes = [8, 32], strides = [1, 1]} : vector<8x96xf32> to vector<8x32xf32>
    %10 = vector.extract_strided_slice %7 {offsets = [0, 64], sizes = [8, 32], strides = [1, 1]} : vector<8x96xf32> to vector<8x32xf32>
    %11 = vector.extract_strided_slice %8 {offsets = [0, 0], sizes = [8, 8], strides = [1, 1]} : vector<8x32xf32> to vector<8x8xf32>
    %12 = vector.extract_strided_slice %9 {offsets = [0, 0], sizes = [8, 8], strides = [1, 1]} : vector<8x32xf32> to vector<8x8xf32>
    %13 = vector.extract_strided_slice %10 {offsets = [0, 0], sizes = [8, 8], strides = [1, 1]} : vector<8x32xf32> to vector<8x8xf32>
    %cst_5 = arith.constant dense<0.000000e+00> : vector<8x8xf32>
    %14 = tpu.matmul %11, %12, %cst_5 {dimension_numbers = #tpu.dot_dimension_numbers<[1], [1], [0], [0], [0, 0, 1, 0], [], []>} : vector<8x8xf32>, vector<8x8xf32>, vector<8x8xf32> -> vector<8x8xf32>
    %cst_6 = arith.constant 0.353553385 : f32
    %15 = vector.broadcast %cst_6 : f32 to vector<8x8xf32>
    %16 = arith.mulf %14, %15 : vector<8x8xf32>
    %cst_7 = arith.constant dense<0xFF800000> : vector<8xf32>
    %17 = vector.multi_reduction <maximumf>, %16, %cst_7 [1] : vector<8x8xf32> to vector<8xf32>
    %18 = vector.shape_cast %17 : vector<8xf32> to vector<8x1xf32>
    %19 = vector.broadcast %18 : vector<8x1xf32> to vector<8x8xf32>
    %20 = arith.subf %16, %19 : vector<8x8xf32>
    %21 = math.exp %20 : vector<8x8xf32>
    %cst_8 = arith.constant dense<0.000000e+00> : vector<8xf32>
    %22 = vector.multi_reduction <add>, %21, %cst_8 [1] : vector<8x8xf32> to vector<8xf32>
    %23 = vector.shape_cast %22 : vector<8xf32> to vector<8x1xf32>
    %24 = vector.broadcast %23 : vector<8x1xf32> to vector<8x8xf32>
    %25 = arith.divf %21, %24 : vector<8x8xf32>
    %cst_9 = arith.constant dense<0.000000e+00> : vector<8x8xf32>
    %26 = tpu.matmul %25, %13, %cst_9 {dimension_numbers = #tpu.dot_dimension_numbers<[1], [0], [0], [1], [0, 0, 1, 1], [], []>} : vector<8x8xf32>, vector<8x8xf32>, vector<8x8xf32> -> vector<8x8xf32>
    %c0_10 = arith.constant 0 : index
    %c0_11 = arith.constant 0 : index
    %27 = vector.load %arg15[%c0_10, %c0_11] : memref<8x32xf32, #tpu.memory_space<vmem>>, vector<8x8xf32>
    tpu.vector_store %arg15[%c0_10, %c0_11], %26 {strides = array<i32>} : memref<8x32xf32, #tpu.memory_space<vmem>>, vector<8x8xf32>,
    %28 = vector.extract_strided_slice %8 {offsets = [0, 8], sizes = [8, 8], strides = [1, 1]} : vector<8x32xf32> to vector<8x8xf32>
    %29 = vector.extract_strided_slice %9 {offsets = [0, 8], sizes = [8, 8], strides = [1, 1]} : vector<8x32xf32> to vector<8x8xf32>
    %30 = vector.extract_strided_slice %10 {offsets = [0, 8], sizes = [8, 8], strides = [1, 1]} : vector<8x32xf32> to vector<8x8xf32>
    %cst_12 = arith.constant dense<0.000000e+00> : vector<8x8xf32>
    %31 = tpu.matmul %28, %29, %cst_12 {dimension_numbers = #tpu.dot_dimension_numbers<[1], [1], [0], [0], [0, 0, 1, 0], [], []>} : vector<8x8xf32>, vector<8x8xf32>, vector<8x8xf32> -> vector<8x8xf32>
    %cst_13 = arith.constant 0.353553385 : f32
    %32 = vector.broadcast %cst_13 : f32 to vector<8x8xf32>
    %33 = arith.mulf %31, %32 : vector<8x8xf32>
    %cst_14 = arith.constant dense<0xFF800000> : vector<8xf32>
    %34 = vector.multi_reduction <maximumf>, %33, %cst_14 [1] : vector<8x8xf32> to vector<8xf32>
    %35 = vector.shape_cast %34 : vector<8xf32> to vector<8x1xf32>
    %36 = vector.broadcast %35 : vector<8x1xf32> to vector<8x8xf32>
    %37 = arith.subf %33, %36 : vector<8x8xf32>
    %38 = math.exp %37 : vector<8x8xf32>
    %cst_15 = arith.constant dense<0.000000e+00> : vector<8xf32>
    %39 = vector.multi_reduction <add>, %38, %cst_15 [1] : vector<8x8xf32> to vector<8xf32>
    %40 = vector.shape_cast %39 : vector<8xf32> to vector<8x1xf32>
    %41 = vector.broadcast %40 : vector<8x1xf32> to vector<8x8xf32>
    %42 = arith.divf %38, %41 : vector<8x8xf32>
    %cst_16 = arith.constant dense<0.000000e+00> : vector<8x8xf32>
    %43 = tpu.matmul %42, %30, %cst_16 {dimension_numbers = #tpu.dot_dimension_numbers<[1], [0], [0], [1], [0, 0, 1, 1], [], []>} : vector<8x8xf32>, vector<8x8xf32>, vector<8x8xf32> -> vector<8x8xf32>
    %c0_17 = arith.constant 0 : index
    %c8 = arith.constant 8 : index
    %44 = vector.load %arg15[%c0_17, %c8] : memref<8x32xf32, #tpu.memory_space<vmem>>, vector<8x8xf32>
    tpu.vector_store %arg15[%c0_17, %c8], %43 {strides = array<i32>} : memref<8x32xf32, #tpu.memory_space<vmem>>, vector<8x8xf32>,
    %45 = vector.extract_strided_slice %8 {offsets = [0, 16], sizes = [8, 8], strides = [1, 1]} : vector<8x32xf32> to vector<8x8xf32>
    %46 = vector.extract_strided_slice %9 {offsets = [0, 16], sizes = [8, 8], strides = [1, 1]} : vector<8x32xf32> to vector<8x8xf32>
    %47 = vector.extract_strided_slice %10 {offsets = [0, 16], sizes = [8, 8], strides = [1, 1]} : vector<8x32xf32> to vector<8x8xf32>
    %cst_18 = arith.constant dense<0.000000e+00> : vector<8x8xf32>
    %48 = tpu.matmul %45, %46, %cst_18 {dimension_numbers = #tpu.dot_dimension_numbers<[1], [1], [0], [0], [0, 0, 1, 0], [], []>} : vector<8x8xf32>, vector<8x8xf32>, vector<8x8xf32> -> vector<8x8xf32>
    %cst_19 = arith.constant 0.353553385 : f32
    %49 = vector.broadcast %cst_19 : f32 to vector<8x8xf32>
    %50 = arith.mulf %48, %49 : vector<8x8xf32>
    %cst_20 = arith.constant dense<0xFF800000> : vector<8xf32>
    %51 = vector.multi_reduction <maximumf>, %50, %cst_20 [1] : vector<8x8xf32> to vector<8xf32>
    %52 = vector.shape_cast %51 : vector<8xf32> to vector<8x1xf32>
    %53 = vector.broadcast %52 : vector<8x1xf32> to vector<8x8xf32>
    %54 = arith.subf %50, %53 : vector<8x8xf32>
    %55 = math.exp %54 : vector<8x8xf32>
    %cst_21 = arith.constant dense<0.000000e+00> : vector<8xf32>
    %56 = vector.multi_reduction <add>, %55, %cst_21 [1] : vector<8x8xf32> to vector<8xf32>
    %57 = vector.shape_cast %56 : vector<8xf32> to vector<8x1xf32>
    %58 = vector.broadcast %57 : vector<8x1xf32> to vector<8x8xf32>
    %59 = arith.divf %55, %58 : vector<8x8xf32>
    %cst_22 = arith.constant dense<0.000000e+00> : vector<8x8xf32>
    %60 = tpu.matmul %59, %47, %cst_22 {dimension_numbers = #tpu.dot_dimension_numbers<[1], [0], [0], [1], [0, 0, 1, 1], [], []>} : vector<8x8xf32>, vector<8x8xf32>, vector<8x8xf32> -> vector<8x8xf32>
    %c0_23 = arith.constant 0 : index
    %c16 = arith.constant 16 : index
    %61 = vector.load %arg15[%c0_23, %c16] : memref<8x32xf32, #tpu.memory_space<vmem>>, vector<8x8xf32>
    tpu.vector_store %arg15[%c0_23, %c16], %60 {strides = array<i32>} : memref<8x32xf32, #tpu.memory_space<vmem>>, vector<8x8xf32>,
    %62 = vector.extract_strided_slice %8 {offsets = [0, 24], sizes = [8, 8], strides = [1, 1]} : vector<8x32xf32> to vector<8x8xf32>
    %63 = vector.extract_strided_slice %9 {offsets = [0, 24], sizes = [8, 8], strides = [1, 1]} : vector<8x32xf32> to vector<8x8xf32>
    %64 = vector.extract_strided_slice %10 {offsets = [0, 24], sizes = [8, 8], strides = [1, 1]} : vector<8x32xf32> to vector<8x8xf32>
    %cst_24 = arith.constant dense<0.000000e+00> : vector<8x8xf32>
    %65 = tpu.matmul %62, %63, %cst_24 {dimension_numbers = #tpu.dot_dimension_numbers<[1], [1], [0], [0], [0, 0, 1, 0], [], []>} : vector<8x8xf32>, vector<8x8xf32>, vector<8x8xf32> -> vector<8x8xf32>
    %cst_25 = arith.constant 0.353553385 : f32
    %66 = vector.broadcast %cst_25 : f32 to vector<8x8xf32>
    %67 = arith.mulf %65, %66 : vector<8x8xf32>
    %cst_26 = arith.constant dense<0xFF800000> : vector<8xf32>
    %68 = vector.multi_reduction <maximumf>, %67, %cst_26 [1] : vector<8x8xf32> to vector<8xf32>
    %69 = vector.shape_cast %68 : vector<8xf32> to vector<8x1xf32>
    %70 = vector.broadcast %69 : vector<8x1xf32> to vector<8x8xf32>
    %71 = arith.subf %67, %70 : vector<8x8xf32>
    %72 = math.exp %71 : vector<8x8xf32>
    %cst_27 = arith.constant dense<0.000000e+00> : vector<8xf32>
    %73 = vector.multi_reduction <add>, %72, %cst_27 [1] : vector<8x8xf32> to vector<8xf32>
    %74 = vector.shape_cast %73 : vector<8xf32> to vector<8x1xf32>
    %75 = vector.broadcast %74 : vector<8x1xf32> to vector<8x8xf32>
    %76 = arith.divf %72, %75 : vector<8x8xf32>
    %cst_28 = arith.constant dense<0.000000e+00> : vector<8x8xf32>
    %77 = tpu.matmul %76, %64, %cst_28 {dimension_numbers = #tpu.dot_dimension_numbers<[1], [0], [0], [1], [0, 0, 1, 1], [], []>} : vector<8x8xf32>, vector<8x8xf32>, vector<8x8xf32> -> vector<8x8xf32>
    %c0_29 = arith.constant 0 : index
    %c24 = arith.constant 24 : index
    %78 = vector.load %arg15[%c0_29, %c24] : memref<8x32xf32, #tpu.memory_space<vmem>>, vector<8x8xf32>
    tpu.vector_store %arg15[%c0_29, %c24], %77 {strides = array<i32>} : memref<8x32xf32, #tpu.memory_space<vmem>>, vector<8x8xf32>,
    %c0_30 = arith.constant 0 : index
    %c0_31 = arith.constant 0 : index
    %79 = vector.load %arg15[%c0_30, %c0_31] : memref<8x32xf32, #tpu.memory_space<vmem>>, vector<8x32xf32>
    %c0_32 = arith.constant 0 : index
    %c0_33 = arith.constant 0 : index
    %80 = vector.load %arg4[%c0_32, %c0_33] : memref<32x32xf32, #tpu.memory_space<vmem>>, vector<32x32xf32>
    %cst_34 = arith.constant dense<0.000000e+00> : vector<8x32xf32>
    %81 = tpu.matmul %79, %80, %cst_34 {dimension_numbers = #tpu.dot_dimension_numbers<[1], [0], [0], [1], [0, 0, 1, 1], [], []>} : vector<8x32xf32>, vector<32x32xf32>, vector<8x32xf32> -> vector<8x32xf32>
    %c0_35 = arith.constant 0 : index
    %c0_36 = arith.constant 0 : index
    %82 = vector.load %arg5[%c0_35, %c0_36] : memref<1x32xf32, #tpu.memory_space<vmem>>, vector<1x32xf32>
    %83 = vector.shape_cast %82 : vector<1x32xf32> to vector<32xf32>
    %84 = vector.shape_cast %83 : vector<32xf32> to vector<1x32xf32>
    %85 = vector.broadcast %84 : vector<1x32xf32> to vector<8x32xf32>
    %86 = arith.addf %81, %85 : vector<8x32xf32>
    %87 = arith.addf %0, %86 : vector<8x32xf32>
    %cst_37 = arith.constant dense<0.000000e+00> : vector<8xf32>
    %88 = vector.multi_reduction <add>, %87, %cst_37 [1] : vector<8x32xf32> to vector<8xf32>
    %89 = vector.shape_cast %88 : vector<8xf32> to vector<8x1xf32>
    %cst_38 = arith.constant 3.200000e+01 : f32
    %90 = vector.broadcast %cst_38 : f32 to vector<8x1xf32>
    %91 = arith.divf %89, %90 : vector<8x1xf32>
    %92 = arith.mulf %87, %87 : vector<8x32xf32>
    %cst_39 = arith.constant dense<0.000000e+00> : vector<8xf32>
    %93 = vector.multi_reduction <add>, %92, %cst_39 [1] : vector<8x32xf32> to vector<8xf32>
    %94 = vector.shape_cast %93 : vector<8xf32> to vector<8x1xf32>
    %cst_40 = arith.constant 3.200000e+01 : f32
    %95 = vector.broadcast %cst_40 : f32 to vector<8x1xf32>
    %96 = arith.divf %94, %95 : vector<8x1xf32>
    %97 = arith.mulf %91, %91 : vector<8x1xf32>
    %98 = arith.subf %96, %97 : vector<8x1xf32>
    %99 = vector.broadcast %91 : vector<8x1xf32> to vector<8x32xf32>
    %100 = arith.subf %87, %99 : vector<8x32xf32>
    %cst_41 = arith.constant 9.99999974E-6 : f32
    %101 = vector.broadcast %cst_41 : f32 to vector<8x1xf32>
    %102 = arith.addf %98, %101 : vector<8x1xf32>
    %103 = math.rsqrt %102 : vector<8x1xf32>
    %104 = vector.broadcast %103 : vector<8x1xf32> to vector<8x32xf32>
    %105 = arith.mulf %100, %104 : vector<8x32xf32>
    %c0_42 = arith.constant 0 : index
    %c0_43 = arith.constant 0 : index
    %106 = vector.load %arg6[%c0_42, %c0_43] : memref<1x32xf32, #tpu.memory_space<vmem>>, vector<1x32xf32>
    %107 = vector.shape_cast %106 : vector<1x32xf32> to vector<32xf32>
    %108 = vector.shape_cast %107 : vector<32xf32> to vector<1x32xf32>
    %109 = vector.broadcast %108 : vector<1x32xf32> to vector<8x32xf32>
    %110 = arith.mulf %105, %109 : vector<8x32xf32>
    %c0_44 = arith.constant 0 : index
    %c0_45 = arith.constant 0 : index
    %111 = vector.load %arg7[%c0_44, %c0_45] : memref<1x32xf32, #tpu.memory_space<vmem>>, vector<1x32xf32>
    %112 = vector.shape_cast %111 : vector<1x32xf32> to vector<32xf32>
    %113 = vector.shape_cast %112 : vector<32xf32> to vector<1x32xf32>
    %114 = vector.broadcast %113 : vector<1x32xf32> to vector<8x32xf32>
    %115 = arith.addf %110, %114 : vector<8x32xf32>
    %c0_46 = arith.constant 0 : index
    %c0_47 = arith.constant 0 : index
    %116 = vector.load %arg8[%c0_46, %c0_47] : memref<32x64xf32, #tpu.memory_space<vmem>>, vector<32x64xf32>
    %cst_48 = arith.constant dense<0.000000e+00> : vector<8x64xf32>
    %117 = tpu.matmul %115, %116, %cst_48 {dimension_numbers = #tpu.dot_dimension_numbers<[1], [0], [0], [1], [0, 0, 1, 1], [], []>} : vector<8x32xf32>, vector<32x64xf32>, vector<8x64xf32> -> vector<8x64xf32>
    %c0_49 = arith.constant 0 : index
    %c0_50 = arith.constant 0 : index
    %118 = vector.load %arg9[%c0_49, %c0_50] : memref<1x64xf32, #tpu.memory_space<vmem>>, vector<1x64xf32>
    %119 = vector.shape_cast %118 : vector<1x64xf32> to vector<64xf32>
    %120 = vector.shape_cast %119 : vector<64xf32> to vector<1x64xf32>
    %121 = vector.broadcast %120 : vector<1x64xf32> to vector<8x64xf32>
    %122 = arith.addf %117, %121 : vector<8x64xf32>
    %cst_51 = arith.constant 0.000000e+00 : f32
    %123 = vector.broadcast %cst_51 : f32 to vector<8x64xf32>
    %124 = arith.maximumf %122, %123 : vector<8x64xf32>
    %c0_52 = arith.constant 0 : index
    %c0_53 = arith.constant 0 : index
    %125 = vector.load %arg10[%c0_52, %c0_53] : memref<64x32xf32, #tpu.memory_space<vmem>>, vector<64x32xf32>
    %cst_54 = arith.constant dense<0.000000e+00> : vector<8x32xf32>
    %126 = tpu.matmul %124, %125, %cst_54 {dimension_numbers = #tpu.dot_dimension_numbers<[1], [0], [0], [1], [0, 0, 1, 1], [], []>} : vector<8x64xf32>, vector<64x32xf32>, vector<8x32xf32> -> vector<8x32xf32>
    %c0_55 = arith.constant 0 : index
    %c0_56 = arith.constant 0 : index
    %127 = vector.load %arg11[%c0_55, %c0_56] : memref<1x32xf32, #tpu.memory_space<vmem>>, vector<1x32xf32>
    %128 = vector.shape_cast %127 : vector<1x32xf32> to vector<32xf32>
    %129 = vector.shape_cast %128 : vector<32xf32> to vector<1x32xf32>
    %130 = vector.broadcast %129 : vector<1x32xf32> to vector<8x32xf32>
    %131 = arith.addf %126, %130 : vector<8x32xf32>
    %132 = arith.addf %115, %131 : vector<8x32xf32>
    %cst_57 = arith.constant dense<0.000000e+00> : vector<8xf32>
    %133 = vector.multi_reduction <add>, %132, %cst_57 [1] : vector<8x32xf32> to vector<8xf32>
    %134 = vector.shape_cast %133 : vector<8xf32> to vector<8x1xf32>
    %cst_58 = arith.constant 3.200000e+01 : f32
    %135 = vector.broadcast %cst_58 : f32 to vector<8x1xf32>
    %136 = arith.divf %134, %135 : vector<8x1xf32>
    %137 = arith.mulf %132, %132 : vector<8x32xf32>
    %cst_59 = arith.constant dense<0.000000e+00> : vector<8xf32>
    %138 = vector.multi_reduction <add>, %137, %cst_59 [1] : vector<8x32xf32> to vector<8xf32>
    %139 = vector.shape_cast %138 : vector<8xf32> to vector<8x1xf32>
    %cst_60 = arith.constant 3.200000e+01 : f32
    %140 = vector.broadcast %cst_60 : f32 to vector<8x1xf32>
    %141 = arith.divf %139, %140 : vector<8x1xf32>
    %142 = arith.mulf %136, %136 : vector<8x1xf32>
    %143 = arith.subf %141, %142 : vector<8x1xf32>
    %144 = vector.broadcast %136 : vector<8x1xf32> to vector<8x32xf32>
    %145 = arith.subf %132, %144 : vector<8x32xf32>
    %cst_61 = arith.constant 9.99999974E-6 : f32
    %146 = vector.broadcast %cst_61 : f32 to vector<8x1xf32>
    %147 = arith.addf %143, %146 : vector<8x1xf32>
    %148 = math.rsqrt %147 : vector<8x1xf32>
    %149 = vector.broadcast %148 : vector<8x1xf32> to vector<8x32xf32>
    %150 = arith.mulf %145, %149 : vector<8x32xf32>
    %c0_62 = arith.constant 0 : index
    %c0_63 = arith.constant 0 : index
    %151 = vector.load %arg12[%c0_62, %c0_63] : memref<1x32xf32, #tpu.memory_space<vmem>>, vector<1x32xf32>
    %152 = vector.shape_cast %151 : vector<1x32xf32> to vector<32xf32>
    %153 = vector.shape_cast %152 : vector<32xf32> to vector<1x32xf32>
    %154 = vector.broadcast %153 : vector<1x32xf32> to vector<8x32xf32>
    %155 = arith.mulf %150, %154 : vector<8x32xf32>
    %c0_64 = arith.constant 0 : index
    %c0_65 = arith.constant 0 : index
    %156 = vector.load %arg13[%c0_64, %c0_65] : memref<1x32xf32, #tpu.memory_space<vmem>>, vector<1x32xf32>
    %157 = vector.shape_cast %156 : vector<1x32xf32> to vector<32xf32>
    %158 = vector.shape_cast %157 : vector<32xf32> to vector<1x32xf32>
    %159 = vector.broadcast %158 : vector<1x32xf32> to vector<8x32xf32>
    %160 = arith.addf %155, %159 : vector<8x32xf32>
    %c0_66 = arith.constant 0 : index
    %c0_67 = arith.constant 0 : index
    %161 = vector.load %arg14[%c0_66, %c0_67] : memref<8x32xf32, #tpu.memory_space<vmem>>, vector<8x32xf32>
    tpu.vector_store %arg14[%c0_66, %c0_67], %160 {strides = array<i32>} : memref<8x32xf32, #tpu.memory_space<vmem>>, vector<8x32xf32>,
    return
  }
  func.func @transform_0(%arg0: i32) -> (i32, i32) {
    %c0_i32 = arith.constant 0 : i32
    %c0_i32_0 = arith.constant 0 : i32
    return %arg0, %c0_i32 : i32, i32
  }
  func.func @transform_1(%arg0: i32) -> (i32, i32) {
    %c0_i32 = arith.constant 0 : i32
    %c0_i32_0 = arith.constant 0 : i32
    %c0_i32_1 = arith.constant 0 : i32
    return %c0_i32, %c0_i32_0 : i32, i32
  }
  func.func @transform_2(%arg0: i32) -> (i32, i32) {
    %c0_i32 = arith.constant 0 : i32
    %c0_i32_0 = arith.constant 0 : i32
    %c0_i32_1 = arith.constant 0 : i32
    return %c0_i32, %c0_i32_0 : i32, i32
  }
  func.func @transform_3(%arg0: i32) -> (i32, i32) {
    %c0_i32 = arith.constant 0 : i32
    %c0_i32_0 = arith.constant 0 : i32
    %c0_i32_1 = arith.constant 0 : i32
    return %c0_i32, %c0_i32_0 : i32, i32
  }
  func.func @transform_4(%arg0: i32) -> (i32, i32) {
    %c0_i32 = arith.constant 0 : i32
    %c0_i32_0 = arith.constant 0 : i32
    %c0_i32_1 = arith.constant 0 : i32
    return %c0_i32, %c0_i32_0 : i32, i32
  }
  func.func @transform_5(%arg0: i32) -> (i32, i32) {
    %c0_i32 = arith.constant 0 : i32
    %c0_i32_0 = arith.constant 0 : i32
    %c0_i32_1 = arith.constant 0 : i32
    return %c0_i32, %c0_i32_0 : i32, i32
  }
  func.func @transform_6(%arg0: i32) -> (i32, i32) {
    %c0_i32 = arith.constant 0 : i32
    %c0_i32_0 = arith.constant 0 : i32
    %c0_i32_1 = arith.constant 0 : i32
    return %c0_i32, %c0_i32_0 : i32, i32
  }
  func.func @transform_7(%arg0: i32) -> (i32, i32) {
    %c0_i32 = arith.constant 0 : i32
    %c0_i32_0 = arith.constant 0 : i32
    %c0_i32_1 = arith.constant 0 : i32
    return %c0_i32, %c0_i32_0 : i32, i32
  }
  func.func @transform_8(%arg0: i32) -> (i32, i32) {
    %c0_i32 = arith.constant 0 : i32
    %c0_i32_0 = arith.constant 0 : i32
    %c0_i32_1 = arith.constant 0 : i32
    return %c0_i32, %c0_i32_0 : i32, i32
  }
  func.func @transform_9(%arg0: i32) -> (i32, i32) {
    %c0_i32 = arith.constant 0 : i32
    %c0_i32_0 = arith.constant 0 : i32
    %c0_i32_1 = arith.constant 0 : i32
    return %c0_i32, %c0_i32_0 : i32, i32
  }
  func.func @transform_10(%arg0: i32) -> (i32, i32) {
    %c0_i32 = arith.constant 0 : i32
    %c0_i32_0 = arith.constant 0 : i32
    %c0_i32_1 = arith.constant 0 : i32
    return %c0_i32, %c0_i32_0 : i32, i32
  }
  func.func @transform_11(%arg0: i32) -> (i32, i32) {
    %c0_i32 = arith.constant 0 : i32
    %c0_i32_0 = arith.constant 0 : i32
    %c0_i32_1 = arith.constant 0 : i32
    return %c0_i32, %c0_i32_0 : i32, i32
  }
  func.func @transform_12(%arg0: i32) -> (i32, i32) {
    %c0_i32 = arith.constant 0 : i32
    %c0_i32_0 = arith.constant 0 : i32
    %c0_i32_1 = arith.constant 0 : i32
    return %c0_i32, %c0_i32_0 : i32, i32
  }
  func.func @transform_13(%arg0: i32) -> (i32, i32) {
    %c0_i32 = arith.constant 0 : i32
    %c0_i32_0 = arith.constant 0 : i32
    return %arg0, %c0_i32 : i32, i32
  }
}

</mosaic_0001>

<bundles_post_ra>
// kernel: tpu_custom_call.1
= control target key start
LH: loop header
LB: loop body
LE: loop exit
PB: predicated region body
PF: predicated region fallthrough
CT: control target
= control target key end

     0   :  { %s2722_s0 = inlined_call_operand.hbm [shape: f32[16,32], index: 0, kind: input, shape index: {}]   ;;  %s2723_s1 = inlined_call_operand.vmem [shape: f32[32,96], index: 1, kind: input, shape index: {}]   ;;  %s2724_s2 = inlined_call_operand.vmem [shape: f32[1,96], index: 2, kind: input, shape index: {}]   ;;  %s2725_s3 = inlined_call_operand.vmem [shape: f32[32,32], index: 3, kind: input, shape index: {}]   ;;  %s2726_s4 = inlined_call_operand.vmem [shape: f32[1,32], index: 4, kind: input, shape index: {}]   ;;  %s2727_s5 = inlined_call_operand.hbm [shape: f32[1,32], index: 5, kind: input, shape index: {}]   ;;  %s2728_s6 = inlined_call_operand.hbm [shape: f32[1,32], index: 6, kind: input, shape index: {}]   ;;  %s2729_s7 = inlined_call_operand.vmem [shape: f32[32,64], index: 7, kind: input, shape index: {}]   ;;  %s2730_s8 = inlined_call_operand.hbm [shape: f32[1,64], index: 8, kind: input, shape index: {}]   ;;  %s2731_s9 = inlined_call_operand.vmem [shape: f32[64,32], index: 9, kind: input, shape index: {}]   ;;  %s2732_s10 = inlined_call_operand.vmem [shape: f32[1,32], index: 10, kind: input, shape index: {}]   ;;  %s2733_s11 = inlined_call_operand.vmem [shape: f32[1,32], index: 11, kind: input, shape index: {}]   ;;  %s2734_s12 = inlined_call_operand.vmem [shape: f32[1,32], index: 12, kind: input, shape index: {}]   ;;  %s2735_s13 = inlined_call_operand.hbm [shape: f32[16,32], index: 13, kind: output, shape index: {}]  }
   0x1   :  { %2742 = sst [smem:[#allocation18_spill]] %s2722_s0 }
   0x2   :  { %2743 = sst [smem:[#allocation19_spill]] %s2723_s1 }
   0x3   :  { %2744 = sst [smem:[#allocation20_spill]] %s2733_s11 }
   0x4   :  { %2745 = sst [smem:[#allocation21_spill]] %s2734_s12 }
   0x5   :  { %2746 = sst [smem:[#allocation22_spill]] %s2735_s13 }
   0x6   :  { %18 = vsyncpa [#allocation4], 0 }
   0x7   :  { %20 = vsyncpa [#allocation4 + $0x1], 0 }
   0x8   :  { %21 = vsyncpa [#allocation7], 0 }
   0x9   :  { %22 = vsyncpa [#allocation10], 0 }
   0xa   :  { %23 = vsyncpa [#allocation5], 0 }
   0xb   :  { %25 = vsyncpa [#allocation5 + $0x1], 0  ;;  %s2301_s25 = smov 0   ;;  %s2303_s26 = smov 0  }
   0xc   :  { %s2305_s27 = smov 0   ;;  %s2307_s28 = smov 0  }
   0xd LB: > { %2747 = sst [smem:[#allocation16_spill]] %s2195_s25  ;;  %s2322_s29 = sadd.s32 4294967295, %s2207_s28   ;;  %s2207_s28 = sphi %s2307_s28, %s2775_s28   ;;  %s2203_s27 = sphi %s2305_s27, %s2774_s27   ;;  %s2199_s26 = sphi %s2303_s26, %s2773_s26   ;;  %s2195_s25 = sphi %s2301_s25, %s2772_s25  }
   0xe   : > { %s1701_s30 = sadd.s32 4294967294, %s2207_s28   ;;  %p51_p0 = scmp.ne.s32.totalorder %s2199_s26, %s2195_s25 }
   0xf   : > { %p2739_p1 = scmp.eq.s32.totalorder %s2322_s29, 0  ;;  %p333_p3 = scmp.eq.s32.totalorder %s1701_s30, 1 }
  0x10   : > { %p1702_p5 = scmp.ge.s32.totalorder %s2207_s28, 1  ;;  %p340_p7 = scmp.lt.s32.totalorder %s2207_s28, 3 }
  0x11   : > { %p2331_p4 = por %p2739_p1, %p51_p0  ;;  %p2336_p6 = por %p333_p3, %p51_p0 }
  0x12   : > { %p2341_p8 = pnand %p1702_p5, %p340_p7  ;;  %s2209_s17 = smov [#allocation6]  }
  0x13   : > { %s2748_s14 = scalar_select %p2331_p4, 1, 0 }
  0x14   : > { %s2749_s15 = scalar_select %p2336_p6, 1, 0 }
  0x15   : > { %s2751_s16 = scalar_select %p2341_p8, 1, 0 }
  0x16   : > { %2750 = sst [smem:[#allocation17_spill]] %s2749_s15  ;;  %s365_s18 = sshll.u32 %s2209_s17, 4  ;;  %s366_s18 = int_to_ptr.vmem [resolvable:$true] %s365_s18 }
  0x17   : > { %p1921_p10 = pneg %p2341_p8  ;;  %s2210_s19 = smov [#allocation8]  }
  0x18   : > { %s376_s20 = sshll.u32 %s2210_s19, 4  ;;  %s2211_s22 = smov [#allocation9]   ;;  %s2354_s20 = int_to_ptr.vmem [resolvable:$true] %s376_s20 }
  0x19   : > { %p2350_p11 = pnand %p1921_p10, %p2739_p1  ;;  %s390_s23 = sshll.u32 %s2211_s22, 4  ;;  %s2356_s23 = int_to_ptr.vmem [resolvable:$true] %s390_s23 }
  0x1a   : > { %s2019_s17 = scalar_lea.hbm %s2727_s5, 16 }
  0x1b   : > { %p2020_p12 = scmp.ne.s32.totalorder %s2727_s5, %s2019_s17  ;;  %p2366_p13 = pneg %p2350_p11 }
  0x1c   : > { %p2026_p5 = scmp.lt.u32.totalorder %s2019_s17, %s2727_s5 }
  0x1d   : > { %p2022_p0 = pnand %p2366_p13, %p2020_p12 }
  0x1f   : > { %p2023_p3 = pneg %p2022_p0 }
  0x21   : > { %p2028_p7 = pnand %p2026_p5, %p2023_p3 }
  0x23   : > { %2031 = shalt.err (!%p2028_p7)
}
  0x24   : > { %s2032_s24 = scalar_lea.vmem %s366_s18, 16  ;;  %s2039_s25 = scalar_lea.vmem %s366_s18, 32 }
  0x25   : > { %p2033_p10 = scmp.ne.s32.totalorder %s366_s18, %s2032_s24  ;;  %p2040_p2 = scmp.lt.s32.totalorder %s366_s18, %s366_s18 }
  0x26   : > { %p2041_p6 = scmp.lt.s32.totalorder %s2039_s25, %s2032_s24 }
  0x27   : > { %p2035_p9 = pnand %p2033_p10, %p2366_p13 }
  0x28   : > { %p2042_p4 = por %p2041_p6, %p2040_p2 }
  0x29   : > { %p2036_p1 = pneg %p2035_p9 }
  0x2b   : > { %p2043_p8 = pnand %p2042_p4, %p2036_p1 }
  0x2d   : > { %2046 = shalt.err (!%p2043_p8)
}
  0x2e   : > { %1924 = dma.hbm_to_vmem [thread:$0]  (!%p2350_p11), %s2727_s5, 16, %s366_s18, [#allocation7]  }
  0x2f   : > { %s2047_s22 = scalar_lea.hbm %s2728_s6, 16 }
  0x30   : > { %p2048_p9 = scmp.ne.s32.totalorder %s2728_s6, %s2047_s22  ;;  %p2054_p1 = scmp.lt.u32.totalorder %s2047_s22, %s2728_s6 }
  0x32   : > { %p2050_p12 = pnand %p2048_p9, %p2366_p13 }
  0x34   : > { %p2051_p2 = pneg %p2050_p12 }
  0x36   : > { %p2056_p4 = pnand %p2054_p1, %p2051_p2 }
  0x38   : > { %2059 = shalt.err (!%p2056_p4)
}
  0x39   : > { %s2060_s18 = scalar_lea.vmem %s2354_s20, 16  ;;  %s2067_s11 = scalar_lea.vmem %s2354_s20, 32 }
  0x3a   : > { %p2061_p6 = scmp.ne.s32.totalorder %s2354_s20, %s2060_s18  ;;  %p2068_p3 = scmp.lt.s32.totalorder %s2354_s20, %s2354_s20 }
  0x3b   : > { %p2069_p5 = scmp.lt.s32.totalorder %s2067_s11, %s2060_s18 }
  0x3c   : > { %p2063_p8 = pnand %p2061_p6, %p2366_p13 }
  0x3d   : > { %p2070_p7 = por %p2069_p5, %p2068_p3 }
  0x3e   : > { %p2064_p0 = pneg %p2063_p8 }
  0x40   : > { %p2071_p10 = pnand %p2070_p7, %p2064_p0 }
  0x42   : > { %2074 = shalt.err (!%p2071_p10)
}
  0x43   : > { %1927 = dma.hbm_to_vmem [thread:$0]  (!%p2350_p11), %s2728_s6, 16, %s2354_s20, [#allocation7]  }
  0x44   : > { %s2075_s17 = scalar_lea.hbm %s2730_s8, 16 }
  0x45   : > { %p2076_p9 = scmp.ne.s32.totalorder %s2730_s8, %s2075_s17  ;;  %p2082_p1 = scmp.lt.u32.totalorder %s2075_s17, %s2730_s8 }
  0x47   : > { %p2078_p12 = pnand %p2076_p9, %p2366_p13 }
  0x49   : > { %p2079_p2 = pneg %p2078_p12 }
  0x4b   : > { %p2084_p4 = pnand %p2082_p1, %p2079_p2 }
  0x4d   : > { %2087 = shalt.err (!%p2084_p4)
}
  0x4e   : > { %s2088_s20 = scalar_lea.vmem %s2356_s23, 16  ;;  %s2095_s11 = scalar_lea.vmem %s2356_s23, 32 }
  0x4f   : > { %p2089_p6 = scmp.ne.s32.totalorder %s2356_s23, %s2088_s20  ;;  %p2096_p3 = scmp.lt.s32.totalorder %s2356_s23, %s2356_s23 }
  0x50   : > { %p2097_p5 = scmp.lt.s32.totalorder %s2095_s11, %s2088_s20 }
  0x51   : > { %p2091_p8 = pnand %p2089_p6, %p2366_p13 }
  0x52   : > { %p2098_p7 = por %p2097_p5, %p2096_p3 }
  0x53   : > { %p2092_p0 = pneg %p2091_p8 }
  0x55   : > { %p2099_p10 = pnand %p2098_p7, %p2092_p0 }
  0x57   : > { %2102 = shalt.err (!%p2099_p10)
}
  0x58   : > { %1930 = dma.hbm_to_vmem [thread:$0]  (!%p2350_p11), %s2730_s8, 16, %s2356_s23, [#allocation10]  }
  0x59   : > { %s2431_s19 = sadd.s32 1, %s2207_s28   ;;  %s38_s30 = sadd.s32 1, %s2203_s27 }
  0x5a   : > { %s35_s21 = ssub.s32 %s2207_s28, %s2431_s19  ;;  %p45_p9 = scmp.ne.s32.totalorder %s2203_s27, %s2199_s26 }
  0x5b   : > { %p36_p13 = scmp.eq.s32.totalorder %s35_s21, 0  ;;  %p46_p12 = scmp.eq.s32.totalorder %s2207_s28, 0 }
  0x5c   : > { %p1942_p2 = scmp.lt.s32.totalorder %s2207_s28, 2  ;;  %p2754_p4 = scmp.eq.s32.totalorder %s2322_s29, 1 }
  0x5d   : > { %s2441_s13 = scalar_select %p36_p13, %s2203_s27, %s38_s30  }
  0x5e   : > { %p47_p1 = por %p46_p12, %p45_p9  ;;  %p2445_p6 = por %p2754_p4, %p45_p9 }
  0x5f   : > { %s413_s22 = sand.u32 1, %s2203_s27   ;;  %s1708_s24 = sshll.u32 %s2207_s28, 7 }
  0x60   : > { %s1707_s23 = sshll.u32 %s413_s22, 3  ;;  %s2756_s0 = sld [smem:[#allocation18_spill]] }
  0x61   : > { %s417_s11 = scalar_lea.vmem [#allocation3], %s1707_s23  ;;  %p2456_p11 = pnand %p1942_p2, %p47_p1 }
  0x62   : > { %s424_s12 = sshll.u32 %s417_s11, 4  ;;  %s414_s21 = scalar_lea.sflag [#allocation4], %s413_s22  ;;  %s2460_s12 = int_to_ptr.vmem [resolvable:$true] %s424_s12 }
  0x63   : > { %p2105_p0 = pneg %p2456_p11 }
  0x66   : > { %s2454_s20 = scalar_lea.hbm %s2756_s0, %s1708_s24  ;;  %s2108_s25 = scalar_lea.hbm %s2756_s0, 256 }
  0x67   : > { %s2103_s30 = scalar_lea.hbm %s2454_s20, 128  ;;  %p2109_p7 = scmp.lt.u32.totalorder %s2454_s20, %s2756_s0 }
  0x68   : > { %p2104_p8 = scmp.ne.s32.totalorder %s2454_s20, %s2103_s30  ;;  %p2110_p10 = scmp.lt.u32.totalorder %s2108_s25, %s2103_s30 }
  0x69   : > { %p2112_p9 = scmp.lt.u32.totalorder %s2103_s30, %s2454_s20 }
  0x6a   : > { %p2106_p3 = pnand %p2105_p0, %p2104_p8  ;;  %p2111_p13 = por %p2110_p10, %p2109_p7 }
  0x6c   : > { %p2107_p5 = pneg %p2106_p3  ;;  %p2113_p12 = por %p2112_p9, %p2111_p13 }
  0x6e   : > { %p2114_p2 = pnand %p2113_p12, %p2107_p5 }
  0x70   : > { %2117 = shalt.err (!%p2114_p2)
}
  0x71   : > { %s2118_s22 = scalar_lea.vmem %s2460_s12, 128  ;;  %s2212_s24 = smov [#allocation3]  }
  0x72   : > { %p2119_p1 = scmp.ne.s32.totalorder %s2460_s12, %s2118_s22  ;;  %s2123_s23 = sshll.u32 %s2212_s24, 4  ;;  %s2124_s23 = int_to_ptr.vmem [resolvable:$false] %s2123_s23 }
  0x73   : > { %s2125_s18 = scalar_lea.vmem %s2124_s23, 256  ;;  %p2126_p3 = scmp.lt.s32.totalorder %s2460_s12, %s2124_s23 }
  0x74   : > { %p2121_p4 = pnand %p2119_p1, %p2105_p0  ;;  %p2127_p7 = scmp.lt.s32.totalorder %s2125_s18, %s2118_s22 }
  0x76   : > { %p2122_p8 = pneg %p2121_p4  ;;  %p2128_p10 = por %p2127_p7, %p2126_p3 }
  0x78   : > { %p2129_p13 = pnand %p2128_p10, %p2122_p8 }
  0x7a   : > { %2132 = shalt.err (!%p2129_p13)
}
  0x7b   : > { %1934 = dma.hbm_to_vmem [thread:$0]  (!%p2456_p11), %s2454_s20, 128, %s2460_s12, %s414_s21  }
  0x7c   : > { %p2758_p5 = scmp.ne.s32.totalorder %s2751_s16, 0 }
  0x7d   : > { %s2490_s30 = sand.u32 (!%p2758_p5), 1, %s2199_s26   ;;  %p2759_p0 = scmp.ne.s32.totalorder (!%p2758_p5), %s2748_s14, 0 }
  0x7e   : > { %433 = sbr.rel (%p2758_p5) target bundleno = 2409 (0x969), region = 72  ;;  %s1710_s25 = sshll.u32 (!%p2758_p5), %s2490_s30, 3 }
  0x7f   : > { %s436_s11 = scalar_lea.sflag (!%p2758_p5), [#allocation4], %s2490_s30  ;;  %s439_s22 = scalar_lea.vmem (!%p2758_p5), [#allocation3], %s1710_s25 }
  0x85   : > { %2178 = dma.done.wait (%p2759_p0), %s436_s11, 128  }
  0x86   : > { %2180 = vsyncadd (%p2759_p0), %s436_s11, 4294967168  ;;  %p2760_p11 = scmp.eq.s32.totalorder %s2322_s29, 0 }
  0x88   : > { %2182 = dma.done.wait (%p2760_p11), [#allocation7], 32   ;;  %p2761_p9 = pmov %p2760_p11 }
  0x8a   : > { %2184 = vsyncadd (%p2761_p9), [#allocation7], 4294967264  ;;  %p2762_p12 = pmov %p2761_p9 }
  0x8b   : > { %p2763_p2 = pmov %p2761_p9 }
  0x8c   : > { %2186 = dma.done.wait (%p2762_p12), [#allocation10], 16  }
  0x8d   : > { %2188 = vsyncadd (%p2763_p2), [#allocation10], 4294967280  ;;  %v2213_v0 = vmov 0.0|0.0   ;;  %vm2214_vm0 = vmmov 0   ;;  %v2215_v1 = vmov 0.0   ;;  %s2764_s1 = sld [smem:[#allocation19_spill]] }
  0x8e   : > { %1875 = vmatprep.subr.bf16.mxu1 %v2213_v0  ;;  %1791 = vmatprep.mubr.msk.f32.mxu1 %vm2214_vm0, %v2215_v1  ;;  %v2527_v8 = vld [vmem:[%s439_s22] sm:$0xff]  ;;  %vm506_vm1 = vcmask 261120   ;;  %v1715_v9 = vld [vmem:[%s2724_s2] ss:$0 sm:$0xff]  ;;  %s2216_s14 = smov 120   ;;  %s2217_s22 = smov 96  }
  0x8f   : > { %1804 = vmatprep.subr.mxu0 %v2215_v1  ;;  %1806 = vmatprep.mubr.msk.f32.mxu0 %vm2214_vm0, %v2215_v1  ;;  %s2218_s16 = smov 80   ;;  %s2219_s20 = smov 88   ;;  %vm583_vm2 = vcmask 64512   ;;  %vm917_vm3 = vcmask 130112   ;;  %vm1089_vm4 = vcmask 195712   ;;  %vm1261_vm5 = vcmask 261312  }
  0x90   : > { %s2220_s12 = smov 72   ;;  %s2221_s15 = smov 112   ;;  %vm1481_vm6 = vcmask 523264  }
  0x91   : > { %s2222_s21 = smov 104   ;;  %s2223_s24 = smov 56  }
  0x92   : > { %s2224_s23 = smov 64   ;;  %s2225_s18 = smov 48  }
  0x93   : > { %v495_v2 = vld [vmem:[%s2764_s1] sm:$0xff]  ;;  %v496_v3 = vld [vmem:[%s2764_s1 + $0x8] sm:$0xff]  ;;  %v497_v4 = vld [vmem:[%s2764_s1 + $0x10] sm:$0xff]  ;;  %s2226_s11 = smov 40   ;;  %s2767_s0 = sld [smem:[#allocation22_spill]] }
  0x94   : > { %v1876_v5 = vpack.c.bf16 %v496_v3, %v495_v2  ;;  %v498_v6 = vld [vmem:[%s2764_s1 + $0x18] sm:$0xff] }
  0x95   : > { %v1879_v7 = vpack.c.bf16 %v498_v6, %v497_v4 }
  0x96   : > { %1877 = vmatpush3.bf16.msra.mxu1 %v1876_v5 }
  0x97   : > { %1878 = vmatprep.subr.bf16.mxu1 %v2213_v0 }
  0x9a   : > { %1880 = vmatpush3.bf16.msra.mxu1 %v1879_v7 }
  0x9b   : > { %1794 = vmatprep.subr.mxu1 %v2215_v1 }
  0x9d   : > { %1792 = vmatmul.mubr.msk.f32.vlgmr.msra.gmra.mrb[0].mxu1 %vm506_vm1, %v2527_v8 }
  0x9e   : > { %1796 = vmatprep.mubr.msk.f32.mxu1 %vm2214_vm0, %v2215_v1 }
 0x170   : > { %v576_v10 = vpop.f32.mrb[0].mxu1 }
 0x171   : > { %v2537_v11 = vadd.f32 %v1715_v9, %v576_v10  ;;  %v1793_v12 = vpop.f32.mrb[1].mxu1 }
 0x173   : > { %747 = vrot.lane.b32.xlu1 %v2537_v11, %s2216_s14  ;;  %581 = vrot.lane.b32.xlu0 %v2537_v11, %s2217_s22  ;;  %s2227_s14 = smov 8   ;;  %s1740_s22 = sshll.u32 %s2322_s29, 7 }
 0x174   : > { %s2677_s1 = scalar_lea.hbm %s2767_s0, %s1740_s22  ;;  %s2230_s29 = smov [#allocation11]  }
 0x177   : > { %921 = vrot.lane.b32.xlu1 %v2537_v11, %s2218_s16  ;;  %749 = vrot.lane.b32.xlu0 %v2537_v11, %s2219_s20  ;;  %s493_s16 = scalar_lea.vmem [#allocation11], %s1710_s25  ;;  %s2137_s25 = sshll.u32 %s2230_s29, 4  ;;  %s2138_s25 = int_to_ptr.vmem [resolvable:$false] %s2137_s25 }
 0x178   : > { %s1602_s20 = sshll.u32 %s493_s16, 4  ;;  %s2679_s20 = int_to_ptr.vmem [resolvable:$true] %s1602_s20 }
 0x179   : > { %p2140_p3 = scmp.lt.s32.totalorder %s2679_s20, %s2138_s25 }
 0x17b   : > { %1093 = vrot.lane.b32.xlu1 %v2537_v11, %s2220_s12  ;;  %919 = vrot.lane.b32.xlu0 %v2537_v11, %s2221_s15 }
 0x17f   : > { %1091 = vrot.lane.b32.xlu0 %v2537_v11, %s2222_s21  ;;  %s1589_s21 = scalar_lea.sflag [#allocation5], %s2490_s30 }
 0x1e5   : > { %v748_v13 = vpop.permute.xlu1 %747  ;;  %v582_v14 = vpop.permute.xlu0 %581 }
 0x1e6   : > { %1795 = vmatpush3.xpose.msk.msra.mxu1 %vm583_vm2, %v582_v14 }
 0x1e7   : > { %1799 = vmatprep.subr.mxu1 %v2215_v1 }
 0x1e9   : > { %1797 = vmatmul.mubr.msk.f32.vlgmr.msra.gmra.mrb[2].mxu1 %vm583_vm2, %v2537_v11  ;;  %v750_v15 = vpop.permute.xlu0 %749  ;;  %v922_v16 = vpop.permute.xlu1 %921 }
 0x1ea   : > { %1805 = vmatpush3.xpose.msk.msra.mxu0 %vm583_vm2, %v750_v15  ;;  %1801 = vmatprep.mubr.msk.f32.mxu1 %vm2214_vm0, %v2215_v1  ;;  %v1264_v15 = vld [vmem:[%s2725_s3] sm:$0xff] }
 0x1eb   : > { %1814 = vmatprep.subr.mxu0 %v2215_v1 }
 0x1ed   : > { %1807 = vmatmul.mubr.msk.f32.vlgmr.msra.gmra.mrb[0].mxu0 %vm583_vm2, %v748_v13  ;;  %v920_v17 = vpop.permute.xlu0 %919  ;;  %v1094_v18 = vpop.permute.xlu1 %1093 }
 0x1ee   : > { %1815 = vmatpush3.xpose.msk.msra.mxu0 %vm583_vm2, %v922_v16  ;;  %1816 = vmatprep.mubr.msk.f32.mxu0 %vm2214_vm0, %v2215_v1  ;;  %v1265_v16 = vld [vmem:[%s2725_s3 + $0x8] sm:$0xff] }
 0x1ef   : > { %1824 = vmatprep.subr.mxu0 %v2215_v1 }
 0x1f1   : > { %1817 = vmatmul.mubr.msk.f32.vlgmr.msra.gmra.mrb[2].mxu0 %vm583_vm2, %v920_v17  ;;  %v1092_v19 = vpop.permute.xlu0 %1091  ;;  %v1882_v17 = vpack.c.bf16 %v1265_v16, %v1264_v15 }
 0x1f2   : > { %1825 = vmatpush3.xpose.msk.msra.mxu0 %vm583_vm2, %v1094_v18  ;;  %1826 = vmatprep.mubr.msk.f32.mxu0 %vm2214_vm0, %v2215_v1  ;;  %v1266_v18 = vld [vmem:[%s2725_s3 + $0x10] sm:$0xff] }
 0x1f3   : > { %1881 = vmatprep.subr.bf16.mxu0 %v2213_v0 }
 0x1f5   : > { %1827 = vmatmul.mubr.msk.f32.vlgmr.msra.gmra.mrb[4].mxu0 %vm583_vm2, %v1092_v19  ;;  %v1267_v19 = vld [vmem:[%s2725_s3 + $0x18] sm:$0xff] }
 0x1f6   : > { %1842 = vmatprep.mubr.msk.f32.mxu0 %vm2214_vm0, %v2215_v1  ;;  %1883 = vmatpush3.bf16.msra.mxu0 %v1882_v17 }
 0x1f7   : > { %1884 = vmatprep.subr.bf16.mxu0 %v2213_v0 }
 0x2bc   : > { %v654_v20 = vpop.f32.mrb[2].mxu1 }
 0x2bd   : > { %v658_v21 = vmul.f32 0.35355338, %v654_v20  ;;  %v1798_v22 = vpop.f32.mrb[3].mxu1  ;;  %v1885_v20 = vpack.c.bf16 %v1267_v19, %v1266_v18 }
 0x2bf   : > { %v659_v23 = vsel %vm583_vm2, %v658_v21, -inf  ;;  %1886 = vmatpush3.bf16.msra.mxu0 %v1885_v20 }
 0x2c0   : > { %v821_v24 = vpop.f32.mrb[0].mxu0  ;;  %660 = vmax.xlane.f32.xlu1 %v659_v23  ;;  %1893 = vmatprep.subr.bf16.mxu0 %v2213_v0 }
 0x2c1   : > { %v825_v25 = vmul.f32 0.35355338, %v821_v24  ;;  %v1808_v26 = vpop.f32.mrb[1].mxu0 }
 0x2c3   : > { %v826_v27 = vsel %vm583_vm2, %v825_v25, -inf }
 0x2c4   : > { %827 = vmax.xlane.f32.xlu0 %v826_v27  ;;  %v993_v28 = vpop.f32.mrb[2].mxu0 }
 0x2c5   : > { %v997_v29 = vmul.f32 0.35355338, %v993_v28  ;;  %v1818_v30 = vpop.f32.mrb[3].mxu0 }
 0x2c7   : > { %v998_v31 = vsel %vm583_vm2, %v997_v29, -inf }
 0x2c8   : > { %999 = vmax.xlane.f32.xlu0 %v998_v31  ;;  %v1165_v32 = vpop.f32.mrb[4].mxu0 }
 0x2c9   : > { %v1169_v33 = vmul.f32 0.35355338, %v1165_v32  ;;  %v1828_v34 = vpop.f32.mrb[5].mxu0 }
 0x2cb   : > { %v1170_v35 = vsel %vm583_vm2, %v1169_v33, -inf }
 0x2cc   : > { %1171 = vmax.xlane.f32.xlu1 %v1170_v35 }
 0x2dd   : > { %837 = vrot.lane.b32.xlu1 %v2537_v11, %s2223_s24  ;;  %s2133_s24 = scalar_lea.vmem %s2679_s20, 128 }
 0x2de   : > { %p2134_p1 = scmp.ne.s32.totalorder %s2679_s20, %s2133_s24 }
 0x2e0   : > { %p2135_p4 = pnand %p2134_p1, %p2445_p6 }
 0x2e2   : > { %p2136_p8 = pneg %p2135_p4 }
 0x34d   : > { %v661_v36 = vpop.xlane.xlu1 %660 }
 0x34e   : > { %v662_v37 = vsub.f32 %v658_v21, %v661_v36 }
 0x350   : > { %v663_v38 = vmul.f32 1.442695, %v662_v37  ;;  %v1382_v37 = vld [vmem:[%s2729_s7 + $0x8] sm:$0xff] }
 0x351   : > { %v828_v39 = vpop.xlane.xlu0 %827 }
 0x352   : > { %1999 = vpow2.f32 %v663_v38  ;;  %v829_v40 = vsub.f32 %v825_v25, %v828_v39  ;;  %v1384_v39 = vld [vmem:[%s2729_s7 + $0x18] sm:$0xff] }
 0x354   : > { %v830_v41 = vmul.f32 1.442695, %v829_v40 }
 0x355   : > { %v1000_v51 = vpop.xlane.xlu0 %999 }
 0x356   : > { %2001 = vpow2.f32 %v830_v41  ;;  %v1001_v52 = vsub.f32 %v997_v29, %v1000_v51  ;;  %v1729_v29 = vld [vmem:[%s2726_s4] ss:$0 sm:$0xff] }
 0x357   : > { %v1466_v41 = vld [vmem:[%s2731_s9] sm:$0xff] }
 0x358   : > { %v1002_v53 = vmul.f32 1.442695, %v1001_v52 }
 0x359   : > { %v1172_v42 = vpop.xlane.xlu1 %1171 }
 0x35a   : > { %v1173_v43 = vsub.f32 %v1169_v33, %v1172_v42  ;;  %v1467_v42 = vld [vmem:[%s2731_s9 + $0x8] sm:$0xff] }
 0x35c   : > { %v2000_v44 = vpop.eup %1999  ;;  %v1174_v45 = vmul.f32 1.442695, %v1173_v43  ;;  %v1468_v43 = vld [vmem:[%s2731_s9 + $0x10] sm:$0xff] }
 0x35d   : > { %v665_v46 = vsel %vm583_vm2, %v2000_v44, 0.0  ;;  %v838_v56 = vpop.permute.xlu1 %837 }
 0x35e   : > { %2003 = vpow2.f32 %v1174_v45  ;;  %666 = vadd.xlane.f32.xlu0 %v665_v46  ;;  %v1469_v45 = vld [vmem:[%s2731_s9 + $0x18] sm:$0xff] }
 0x35f   : > { %2005 = vpow2.f32 %v1002_v53  ;;  %v1897_v46 = vpack.c.bf16 %v1469_v45, %v1468_v43 }
 0x360   : > { %v2002_v47 = vpop.eup %2001 }
 0x361   : > { %v832_v48 = vsel %vm583_vm2, %v2002_v47, 0.0 }
 0x362   : > { %833 = vadd.xlane.f32.xlu1 %v832_v48  ;;  %v1471_v48 = vld [vmem:[%s2731_s9 + $0x28] sm:$0xff] }
 0x368   : > { %v2004_v49 = vpop.eup %2003 }
 0x369   : > { %v1176_v50 = vsel %vm583_vm2, %v2004_v49, 0.0  ;;  %v2006_v54 = vpop.eup %2005 }
 0x36a   : > { %1177 = vadd.xlane.f32.xlu1 %v1176_v50  ;;  %v1004_v55 = vsel %vm583_vm2, %v2006_v54, 0.0 }
 0x374   : > { %670 = vrot.lane.b32.xlu0 %v2537_v11, %s2224_s23  ;;  %s2765_s23 = sld [smem:[#allocation20_spill]] }
 0x37b   : > { %1009 = vrot.lane.b32.xlu1 %v2537_v11, %s2225_s18  ;;  %s2228_s18 = smov 16  }
 0x393   : > { %1005 = vadd.xlane.f32.xlu0 %v1004_v55 }
 0x3a9   : > { %1181 = vrot.lane.b32.xlu0 %v2537_v11, %s2226_s11  ;;  %s2229_s11 = smov 24  }
 0x3eb   : > { %v667_v57 = vpop.xlane.xlu0 %666 }
 0x3ec   : > { %2007 = vrcp.f32 %v667_v57 }
 0x3ef   : > { %v671_v58 = vpop.permute.xlu0 %670  ;;  %v834_v59 = vpop.xlane.xlu1 %833 }
 0x3f0   : > { %2009 = vrcp.f32 %v834_v59  ;;  %1800 = vmatpush3.msra.mxu1 %v671_v58  ;;  %v1731_v59 = vld [vmem:[#allocation6] ss:$0 sm:$0xff] }
 0x3f1   : > { %1809 = vmatprep.subr.mxu1 %v2215_v1 }
 0x3f6   : > { %v2008_v60 = vpop.eup %2007 }
 0x3f7   : > { %v669_v61 = vmul.f32 %v2008_v60, %v2000_v44  ;;  %v1178_v62 = vpop.xlane.xlu1 %1177  ;;  %v1894_v44 = vpack.c.bf16 %v1467_v42, %v1466_v41 }
 0x3f9   : > { %1802 = vmatmul.mubr.msk.f32.vlgmr.msra.gmra.mrb[4].mxu1 %vm583_vm2, %v669_v61  ;;  %v1732_v61 = vld [vmem:[#allocation8] ss:$0 sm:$0xff] }
 0x3fa   : > { %v2010_v63 = vpop.eup %2009  ;;  %1810 = vmatpush3.msra.mxu1 %v838_v56  ;;  %1811 = vmatprep.mubr.msk.f32.mxu1 %vm2214_vm0, %v2215_v1 }
 0x3fb   : > { %v836_v2 = vmul.f32 %v2010_v63, %v2002_v47  ;;  %v1010_v3 = vpop.permute.xlu1 %1009  ;;  %1819 = vmatprep.subr.mxu1 %v2215_v1  ;;  %v1470_v47 = vld [vmem:[%s2731_s9 + $0x20] sm:$0xff] }
 0x3fd   : > { %1812 = vmatmul.mubr.msk.f32.vlgmr.msra.gmra.mrb[6].mxu1 %vm583_vm2, %v836_v2  ;;  %v1473_v2 = vld [vmem:[%s2731_s9 + $0x38] sm:$0xff] }
 0x3fe   : > { %1820 = vmatpush3.msra.mxu1 %v1010_v3  ;;  %1821 = vmatprep.mubr.msk.f32.mxu1 %vm2214_vm0, %v2215_v1 }
 0x3ff   : > { %1829 = vmatprep.subr.mxu1 %v2215_v1 }
 0x420   : > { %v1006_v4 = vpop.xlane.xlu0 %1005 }
 0x421   : > { %2011 = vrcp.f32 %v1006_v4  ;;  %v1733_v4 = vld [vmem:[#allocation9] ss:$0 sm:$0xff] }
 0x422   : > { %2013 = vrcp.f32 %v1178_v62 }
 0x424   : > { %v1182_v9 = vpop.permute.xlu0 %1181 }
 0x42b   : > { %v2012_v5 = vpop.eup %2011 }
 0x42c   : > { %v1008_v6 = vmul.f32 %v2012_v5, %v2006_v54  ;;  %v2014_v7 = vpop.eup %2013 }
 0x42d   : > { %v1180_v10 = vmul.f32 %v2014_v7, %v2004_v49  ;;  %v1900_v49 = vpack.c.bf16 %v1471_v48, %v1470_v47 }
 0x42e   : > { %1822 = vmatmul.mubr.msk.f32.vlgmr.msra.gmra.mrb[8].mxu1 %vm583_vm2, %v1008_v6 }
 0x42f   : > { %1830 = vmatpush3.msra.mxu1 %v1182_v9  ;;  %1831 = vmatprep.mubr.msk.f32.mxu1 %vm2214_vm0, %v2215_v1 }
 0x430   : > { %1887 = vmatprep.subr.bf16.mxu1 %v2213_v0 }
 0x432   : > { %1832 = vmatmul.mubr.msk.f32.vlgmr.msra.gmra.mrb[10].mxu1 %vm583_vm2, %v1180_v10  ;;  %v1735_v10 = vld [vmem:[%s2732_s10] ss:$0 sm:$0xff] }
 0x433   : > { %1853 = vmatprep.mubr.msk.f32.mxu1 %vm2214_vm0, %v2215_v1 }
 0x4cc   : > { %v742_v11 = vpop.f32.mrb[4].mxu1 }
 0x4cd   : > { %746 = vst.msk [vmem:[#allocation2] sm:$0xff] %vm583_vm2, %v742_v11  ;;  %v1803_v12 = vpop.f32.mrb[5].mxu1 }
 0x4d0   : > { %v909_v13 = vpop.f32.mrb[6].mxu1 }
 0x4d1   : > { %914 = vrot.lane.b32.xlu1 %v909_v13, %s2227_s14  ;;  %v1813_v14 = vpop.f32.mrb[7].mxu1  ;;  %s2766_s14 = sld [smem:[#allocation21_spill]] }
 0x501   : > { %v1081_v21 = vpop.f32.mrb[8].mxu1 }
 0x502   : > { %1086 = vrot.lane.b32.xlu0 %v1081_v21, %s2228_s18  ;;  %v1823_v22 = vpop.f32.mrb[9].mxu1 }
 0x505   : > { %v1253_v23 = vpop.f32.mrb[10].mxu1 }
 0x506   : > { %1258 = vrot.lane.b32.xlu1 %v1253_v23, %s2229_s11  ;;  %v1833_v24 = vpop.f32.mrb[11].mxu1 }
 0x543   : > { %v915_v25 = vpop.permute.xlu1 %914 }
 0x544   : > { %918 = vst.msk [vmem:[#allocation2] sm:$0xff] %vm917_vm3, %v915_v25 }
 0x574   : > { %v1087_v26 = vpop.permute.xlu0 %1086 }
 0x575   : > { %1090 = vst.msk [vmem:[#allocation2] sm:$0xff] %vm1089_vm4, %v1087_v26 }
 0x578   : > { %v1259_v27 = vpop.permute.xlu1 %1258 }
 0x579   : > { %1262 = vst.msk [vmem:[#allocation2] sm:$0xff] %vm1261_vm5, %v1259_v27  ;;  %v1737_v27 = vld [vmem:[%s2765_s23] ss:$0 sm:$0xff]  ;;  %s2139_s23 = scalar_lea.vmem %s2138_s25, 256 }
 0x57a   : > { %p2141_p7 = scmp.lt.s32.totalorder %s2139_s23, %s2133_s24 }
 0x57c   : > { %p2142_p10 = por %p2141_p7, %p2140_p3 }
 0x57e   : > { %p2143_p13 = pnand %p2142_p10, %p2136_p8 }
 0x580   : > { %v1263_v28 = vld [vmem:[#allocation2] sm:$0xff] }
 0x581   : > { %1843 = vmatmul.mubr.msk.f32.vlgmr.msra.gmra.mrb[6].mxu0 %vm506_vm1, %v1263_v28 }
 0x582   : > { %1872 = vmatprep.mubr.msk.f32.mxu0 %vm2214_vm0, %v2215_v1  ;;  %v1381_v1 = vld [vmem:[%s2729_s7] sm:$0xff]  ;;  %1895 = vmatpush3.bf16.msra.mxu0 %v1894_v44 }
 0x583   : > { %v1888_v38 = vpack.c.bf16 %v1382_v37, %v1381_v1  ;;  %1896 = vmatprep.subr.bf16.mxu0 %v2213_v0 }
 0x585   : > { %1889 = vmatpush3.bf16.msra.mxu1 %v1888_v38 }
 0x586   : > { %1890 = vmatprep.subr.bf16.mxu1 %v2213_v0  ;;  %1898 = vmatpush3.bf16.msra.mxu0 %v1897_v46 }
 0x587   : > { %1899 = vmatprep.subr.bf16.mxu0 %v2213_v0 }
 0x58a   : > { %1901 = vmatpush3.bf16.msra.mxu0 %v1900_v49 }
 0x58b   : > { %1902 = vmatprep.subr.bf16.mxu0 %v2213_v0  ;;  %v1472_v0 = vld [vmem:[%s2731_s9 + $0x30] sm:$0xff] }
 0x58c   : > { %v1903_v3 = vpack.c.bf16 %v1473_v2, %v1472_v0 }
 0x58e   : > { %1904 = vmatpush3.bf16.msra.mxu0 %v1903_v3 }
 0x654   : > { %v1344_v30 = vpop.f32.mrb[6].mxu0 }
 0x655   : > { %v1345_v31 = vadd.f32 %v1729_v29, %v1344_v30  ;;  %v1844_v32 = vpop.f32.mrb[7].mxu0  ;;  %v1738_v29 = vld [vmem:[%s2766_s14] ss:$0 sm:$0xff] }
 0x657   : > { %v1348_v33 = vadd.f32 %v1345_v31, %v2527_v8  ;;  %v1383_v8 = vld [vmem:[%s2729_s7 + $0x10] sm:$0xff] }
 0x658   : > { %v1891_v40 = vpack.c.bf16 %v1384_v39, %v1383_v8 }
 0x659   : > { %v1349_v34 = vsel %vm506_vm1, %v1348_v33, 0.0  ;;  %v1354_v35 = vmul.f32 %v1348_v33, %v1348_v33 }
 0x65a   : > { %1350 = vadd.xlane.f32.xlu0 %v1349_v34  ;;  %1892 = vmatpush3.bf16.msra.mxu1 %v1891_v40 }
 0x65b   : > { %v1355_v36 = vsel %vm506_vm1, %v1354_v35, 0.0 }
 0x65c   : > { %1356 = vadd.xlane.f32.xlu1 %v1355_v36 }
 0x6e7   : > { %v1351_v50 = vpop.xlane.xlu0 %1350 }
 0x6e8   : > { %v1353_v51 = vmul.f32 0.03125, %v1351_v50 }
 0x6e9   : > { %v1357_v52 = vpop.xlane.xlu1 %1356 }
 0x6ea   : > { %v1359_v53 = vmul.f32 %v1353_v51, %v1353_v51  ;;  %v1358_v54 = vmul.f32 0.03125, %v1357_v52  ;;  %v1361_v57 = vsub.f32 %v1348_v33, %v1353_v51 }
 0x6ec   : > { %v1360_v55 = vsub.f32 %v1358_v54, %v1359_v53 }
 0x6ee   : > { %v1362_v56 = vadd.f32 1e-05, %v1360_v55 }
 0x6f0   : > { %2015 = vrsqrt.f32 %v1362_v56 }
 0x6fa   : > { %v2016_v58 = vpop.eup %2015 }
 0x6fb   : > { %v1364_v60 = vmul.f32 %v2016_v58, %v1361_v57 }
 0x6fd   : > { %v1372_v62 = vmul.f32 %v1731_v59, %v1364_v60 }
 0x6ff   : > { %v1380_v63 = vadd.f32 %v1732_v61, %v1372_v62 }
 0x701   : > { %1854 = vmatmul.mubr.msk.f32.vlgmr.msra.gmra.mrb[12].mxu1 %vm506_vm1, %v1380_v63 }
 0x7d4   : > { %v1461_v5 = vpop.f32.mrb[12].mxu1 }
 0x7d5   : > { %v1462_v6 = vadd.f32 %v1733_v4, %v1461_v5  ;;  %v1855_v7 = vpop.f32.mrb[13].mxu1 }
 0x7d7   : > { %v1465_v9 = vmax.f32 %v1462_v6, 0.0 }
 0x7d9   : > { %1873 = vmatmul.mubr.msk.f32.vlgmr.msra.gmra.mrb[8].mxu0 %vm1481_vm6, %v1465_v9 }
 0x8ac   : > { %v1551_v11 = vpop.f32.mrb[8].mxu0 }
 0x8ad   : > { %v1552_v12 = vadd.f32 %v1735_v10, %v1551_v11  ;;  %v1874_v13 = vpop.f32.mrb[9].mxu0 }
 0x8af   : > { %v1555_v14 = vadd.f32 %v1552_v12, %v1380_v63 }
 0x8b1   : > { %v1556_v15 = vsel %vm506_vm1, %v1555_v14, 0.0  ;;  %v1560_v16 = vmul.f32 %v1555_v14, %v1555_v14 }
 0x8b2   : > { %1557 = vadd.xlane.f32.xlu0 %v1556_v15 }
 0x8b3   : > { %v1561_v17 = vsel %vm506_vm1, %v1560_v16, 0.0 }
 0x8b6   : > { %1562 = vadd.xlane.f32.xlu0 %v1561_v17 }
 0x93f   : > { %v1558_v18 = vpop.xlane.xlu0 %1557 }
 0x940   : > { %v1559_v19 = vmul.f32 0.03125, %v1558_v18 }
 0x942   : > { %v1565_v21 = vmul.f32 %v1559_v19, %v1559_v19  ;;  %v1567_v25 = vsub.f32 %v1555_v14, %v1559_v19 }
 0x943   : > { %v1563_v20 = vpop.xlane.xlu0 %1562 }
 0x944   : > { %v1564_v22 = vmul.f32 0.03125, %v1563_v20 }
 0x946   : > { %v1566_v23 = vsub.f32 %v1564_v22, %v1565_v21 }
 0x948   : > { %v1568_v24 = vadd.f32 1e-05, %v1566_v23 }
 0x94a   : > { %2017 = vrsqrt.f32 %v1568_v24 }
 0x954   : > { %v2018_v26 = vpop.eup %2017 }
 0x955   : > { %v1570_v28 = vmul.f32 %v2018_v26, %v1567_v25 }
 0x957   : > { %v1578_v30 = vmul.f32 %v1737_v27, %v1570_v28 }
 0x959   : > { %v1586_v31 = vadd.f32 %v1738_v29, %v1578_v30 }
 0x95b   : > { %1587 = vst.msk [vmem:[%s493_s16] sm:$0xff] %vm506_vm1, %v1586_v31 }
 0x95c   : > { %2146 = shalt.err (!%p2143_p13)
}
 0x95d   : > { %s2147_s30 = scalar_lea.hbm %s2677_s1, 128  ;;  %s2151_s14 = scalar_lea.hbm %s2767_s0, 256 }
 0x95e   : > { %p2148_p5 = scmp.ne.s32.totalorder %s2677_s1, %s2147_s30  ;;  %p2152_p9 = scmp.lt.u32.totalorder %s2677_s1, %s2767_s0 }
 0x95f   : > { %p2153_p12 = scmp.lt.u32.totalorder %s2151_s14, %s2147_s30  ;;  %p2155_p1 = scmp.lt.u32.totalorder %s2147_s30, %s2677_s1 }
 0x960   : > { %p2149_p0 = pnand %p2148_p5, %p2445_p6 }
 0x961   : > { %p2154_p2 = por %p2153_p12, %p2152_p9 }
 0x962   : > { %p2150_p11 = pneg %p2149_p0 }
 0x963   : > { %p2156_p4 = por %p2155_p1, %p2154_p2 }
 0x965   : > { %p2157_p8 = pnand %p2156_p4, %p2150_p11 }
 0x967   : > { %2160 = shalt.err (!%p2157_p8)
}
 0x968   : > { %1919 = dma.vmem_to_hbm [thread:$0]  (%p2445_p6), %s2679_s20, 128, %s2677_s1, %s1589_s21  }
 0x969 PF: > { %s2768_s12 = sld [smem:[#allocation16_spill]]  ;;  %s2769_s15 = sld [smem:[#allocation17_spill]] }
 0x96a   : > { %p2771_p7 = scmp.ge.s32.totalorder %s2207_s28, 2 }
 0x96f   : > { %s1614_s24 = sand.u32 1, %s2768_s12   ;;  %p2770_p3 = scmp.ne.s32.totalorder %s2769_s15, 0 }
 0x970   : > { %s1615_s29 = scalar_lea.sflag [#allocation5], %s1614_s24 }
 0x971   : > { %p1936_p10 = pnand %p2771_p7, %p2770_p3 }
 0x973   : > { %2190 = dma.done.wait (!%p1936_p10), %s1615_s29, 128  }
 0x974   : > { %2192 = vsyncadd (!%p1936_p10), %s1615_s29, 4294967168  ;;  %p28_p13 = scmp.ge.s32.totalorder %s2431_s19, 4   ;;  %s2772_s25 = smov %s2199_s26 }
 0x975   : > { %s2773_s26 = smov %s2203_s27  ;;  %s2774_s27 = smov %s2441_s13 }
 0x976   : > { %s2775_s28 = smov %s2431_s19  ;;  %30 = sbr.rel (!%p28_p13) target bundleno = 13 (0xd), region = 129 }
 0x97d   :  { %1620 = vsyncpa [#allocation4], 1 }
 0x97e   :  { %1622 = vsyncpa [#allocation4 + $0x1], 1 }
 0x97f   :  { %1623 = vsyncpa [#allocation7], 1 }
 0x980   :  { %1624 = vsyncpa [#allocation10], 1 }
 0x981   :  { %1625 = vsyncpa [#allocation5], 1 }
 0x982   :  { %1627 = vsyncpa [#allocation5 + $0x1], 1 }

// kernel: tpu_custom_call.1
= control target key start
LH: loop header
LB: loop body
LE: loop exit
PB: predicated region body
PF: predicated region fallthrough
CT: control target
= control target key end

     0   :  { %s2722_s0 = inlined_call_operand.hbm [shape: f32[16,32], index: 0, kind: input, shape index: {}]   ;;  %s2723_s1 = inlined_call_operand.vmem [shape: f32[32,96], index: 1, kind: input, shape index: {}]   ;;  %s2724_s2 = inlined_call_operand.vmem [shape: f32[1,96], index: 2, kind: input, shape index: {}]   ;;  %s2725_s3 = inlined_call_operand.vmem [shape: f32[32,32], index: 3, kind: input, shape index: {}]   ;;  %s2726_s4 = inlined_call_operand.vmem [shape: f32[1,32], index: 4, kind: input, shape index: {}]   ;;  %s2727_s5 = inlined_call_operand.hbm [shape: f32[1,32], index: 5, kind: input, shape index: {}]   ;;  %s2728_s6 = inlined_call_operand.hbm [shape: f32[1,32], index: 6, kind: input, shape index: {}]   ;;  %s2729_s7 = inlined_call_operand.vmem [shape: f32[32,64], index: 7, kind: input, shape index: {}]   ;;  %s2730_s8 = inlined_call_operand.hbm [shape: f32[1,64], index: 8, kind: input, shape index: {}]   ;;  %s2731_s9 = inlined_call_operand.vmem [shape: f32[64,32], index: 9, kind: input, shape index: {}]   ;;  %s2732_s10 = inlined_call_operand.vmem [shape: f32[1,32], index: 10, kind: input, shape index: {}]   ;;  %s2733_s11 = inlined_call_operand.vmem [shape: f32[1,32], index: 11, kind: input, shape index: {}]   ;;  %s2734_s12 = inlined_call_operand.vmem [shape: f32[1,32], index: 12, kind: input, shape index: {}]   ;;  %s2735_s13 = inlined_call_operand.hbm [shape: f32[16,32], index: 13, kind: output, shape index: {}]  }
   0x1   :  { %2742 = sst [smem:[#allocation18_spill]] %s2722_s0 }
   0x2   :  { %2743 = sst [smem:[#allocation19_spill]] %s2723_s1 }
   0x3   :  { %2744 = sst [smem:[#allocation20_spill]] %s2733_s11 }
   0x4   :  { %2745 = sst [smem:[#allocation21_spill]] %s2734_s12 }
   0x5   :  { %2746 = sst [smem:[#allocation22_spill]] %s2735_s13 }
   0x6   :  { %18 = vsyncpa [#allocation4], 0 }
   0x7   :  { %20 = vsyncpa [#allocation4 + $0x1], 0 }
   0x8   :  { %21 = vsyncpa [#allocation7], 0 }
   0x9   :  { %22 = vsyncpa [#allocation10], 0 }
   0xa   :  { %23 = vsyncpa [#allocation5], 0 }
   0xb   :  { %25 = vsyncpa [#allocation5 + $0x1], 0  ;;  %s2301_s25 = smov 0   ;;  %s2303_s26 = smov 0  }
   0xc   :  { %s2305_s27 = smov 0   ;;  %s2307_s28 = smov 0  }
   0xd LB: > { %2747 = sst [smem:[#allocation16_spill]] %s2195_s25  ;;  %s2322_s29 = sadd.s32 4294967295, %s2207_s28   ;;  %s2207_s28 = sphi %s2307_s28, %s2775_s28   ;;  %s2203_s27 = sphi %s2305_s27, %s2774_s27   ;;  %s2199_s26 = sphi %s2303_s26, %s2773_s26   ;;  %s2195_s25 = sphi %s2301_s25, %s2772_s25  }
   0xe   : > { %s1701_s30 = sadd.s32 4294967294, %s2207_s28   ;;  %p51_p0 = scmp.ne.s32.totalorder %s2199_s26, %s2195_s25 }
   0xf   : > { %p2739_p1 = scmp.eq.s32.totalorder %s2322_s29, 0  ;;  %p333_p3 = scmp.eq.s32.totalorder %s1701_s30, 1 }
  0x10   : > { %p1702_p5 = scmp.ge.s32.totalorder %s2207_s28, 1  ;;  %p340_p7 = scmp.lt.s32.totalorder %s2207_s28, 3 }
  0x11   : > { %p2331_p4 = por %p2739_p1, %p51_p0  ;;  %p2336_p6 = por %p333_p3, %p51_p0 }
  0x12   : > { %p2341_p8 = pnand %p1702_p5, %p340_p7  ;;  %s2209_s17 = smov [#allocation6]  }
  0x13   : > { %s2748_s14 = scalar_select %p2331_p4, 1, 0 }
  0x14   : > { %s2749_s15 = scalar_select %p2336_p6, 1, 0 }
  0x15   : > { %s2751_s16 = scalar_select %p2341_p8, 1, 0 }
  0x16   : > { %2750 = sst [smem:[#allocation17_spill]] %s2749_s15  ;;  %s365_s18 = sshll.u32 %s2209_s17, 4  ;;  %s366_s18 = int_to_ptr.vmem [resolvable:$true] %s365_s18 }
  0x17   : > { %p1921_p10 = pneg %p2341_p8  ;;  %s2210_s19 = smov [#allocation8]  }
  0x18   : > { %s376_s20 = sshll.u32 %s2210_s19, 4  ;;  %s2211_s22 = smov [#allocation9]   ;;  %s2354_s20 = int_to_ptr.vmem [resolvable:$true] %s376_s20 }
  0x19   : > { %p2350_p11 = pnand %p1921_p10, %p2739_p1  ;;  %s390_s23 = sshll.u32 %s2211_s22, 4  ;;  %s2356_s23 = int_to_ptr.vmem [resolvable:$true] %s390_s23 }
  0x1a   : > { %s2019_s17 = scalar_lea.hbm %s2727_s5, 16 }
  0x1b   : > { %p2020_p12 = scmp.ne.s32.totalorder %s2727_s5, %s2019_s17  ;;  %p2366_p13 = pneg %p2350_p11 }
  0x1c   : > { %p2026_p5 = scmp.lt.u32.totalorder %s2019_s17, %s2727_s5 }
  0x1d   : > { %p2022_p0 = pnand %p2366_p13, %p2020_p12 }
  0x1f   : > { %p2023_p3 = pneg %p2022_p0 }
  0x21   : > { %p2028_p7 = pnand %p2026_p5, %p2023_p3 }
  0x23   : > { %2031 = shalt.err (!%p2028_p7)
}
  0x24   : > { %s2032_s24 = scalar_lea.vmem %s366_s18, 16  ;;  %s2039_s25 = scalar_lea.vmem %s366_s18, 32 }
  0x25   : > { %p2033_p10 = scmp.ne.s32.totalorder %s366_s18, %s2032_s24  ;;  %p2040_p2 = scmp.lt.s32.totalorder %s366_s18, %s366_s18 }
  0x26   : > { %p2041_p6 = scmp.lt.s32.totalorder %s2039_s25, %s2032_s24 }
  0x27   : > { %p2035_p9 = pnand %p2033_p10, %p2366_p13 }
  0x28   : > { %p2042_p4 = por %p2041_p6, %p2040_p2 }
  0x29   : > { %p2036_p1 = pneg %p2035_p9 }
  0x2b   : > { %p2043_p8 = pnand %p2042_p4, %p2036_p1 }
  0x2d   : > { %2046 = shalt.err (!%p2043_p8)
}
  0x2e   : > { %1924 = dma.hbm_to_vmem [thread:$0]  (!%p2350_p11), %s2727_s5, 16, %s366_s18, [#allocation7]  }
  0x2f   : > { %s2047_s22 = scalar_lea.hbm %s2728_s6, 16 }
  0x30   : > { %p2048_p9 = scmp.ne.s32.totalorder %s2728_s6, %s2047_s22  ;;  %p2054_p1 = scmp.lt.u32.totalorder %s2047_s22, %s2728_s6 }
  0x32   : > { %p2050_p12 = pnand %p2048_p9, %p2366_p13 }
  0x34   : > { %p2051_p2 = pneg %p2050_p12 }
  0x36   : > { %p2056_p4 = pnand %p2054_p1, %p2051_p2 }
  0x38   : > { %2059 = shalt.err (!%p2056_p4)
}
  0x39   : > { %s2060_s18 = scalar_lea.vmem %s2354_s20, 16  ;;  %s2067_s11 = scalar_lea.vmem %s2354_s20, 32 }
  0x3a   : > { %p2061_p6 = scmp.ne.s32.totalorder %s2354_s20, %s2060_s18  ;;  %p2068_p3 = scmp.lt.s32.totalorder %s2354_s20, %s2354_s20 }
  0x3b   : > { %p2069_p5 = scmp.lt.s32.totalorder %s2067_s11, %s2060_s18 }
  0x3c   : > { %p2063_p8 = pnand %p2061_p6, %p2366_p13 }
  0x3d   : > { %p2070_p7 = por %p2069_p5, %p2068_p3 }
  0x3e   : > { %p2064_p0 = pneg %p2063_p8 }
  0x40   : > { %p2071_p10 = pnand %p2070_p7, %p2064_p0 }
  0x42   : > { %2074 = shalt.err (!%p2071_p10)
}
  0x43   : > { %1927 = dma.hbm_to_vmem [thread:$0]  (!%p2350_p11), %s2728_s6, 16, %s2354_s20, [#allocation7]  }
  0x44   : > { %s2075_s17 = scalar_lea.hbm %s2730_s8, 16 }
  0x45   : > { %p2076_p9 = scmp.ne.s32.totalorder %s2730_s8, %s2075_s17  ;;  %p2082_p1 = scmp.lt.u32.totalorder %s2075_s17, %s2730_s8 }
  0x47   : > { %p2078_p12 = pnand %p2076_p9, %p2366_p13 }
  0x49   : > { %p2079_p2 = pneg %p2078_p12 }
  0x4b   : > { %p2084_p4 = pnand %p2082_p1, %p2079_p2 }
  0x4d   : > { %2087 = shalt.err (!%p2084_p4)
}
  0x4e   : > { %s2088_s20 = scalar_lea.vmem %s2356_s23, 16  ;;  %s2095_s11 = scalar_lea.vmem %s2356_s23, 32 }
  0x4f   : > { %p2089_p6 = scmp.ne.s32.totalorder %s2356_s23, %s2088_s20  ;;  %p2096_p3 = scmp.lt.s32.totalorder %s2356_s23, %s2356_s23 }
  0x50   : > { %p2097_p5 = scmp.lt.s32.totalorder %s2095_s11, %s2088_s20 }
  0x51   : > { %p2091_p8 = pnand %p2089_p6, %p2366_p13 }
  0x52   : > { %p2098_p7 = por %p2097_p5, %p2096_p3 }
  0x53   : > { %p2092_p0 = pneg %p2091_p8 }
  0x55   : > { %p2099_p10 = pnand %p2098_p7, %p2092_p0 }
  0x57   : > { %2102 = shalt.err (!%p2099_p10)
}
  0x58   : > { %1930 = dma.hbm_to_vmem [thread:$0]  (!%p2350_p11), %s2730_s8, 16, %s2356_s23, [#allocation10]  }
  0x59   : > { %s2431_s19 = sadd.s32 1, %s2207_s28   ;;  %s38_s30 = sadd.s32 1, %s2203_s27 }
  0x5a   : > { %s35_s21 = ssub.s32 %s2207_s28, %s2431_s19  ;;  %p45_p9 = scmp.ne.s32.totalorder %s2203_s27, %s2199_s26 }
  0x5b   : > { %p36_p13 = scmp.eq.s32.totalorder %s35_s21, 0  ;;  %p46_p12 = scmp.eq.s32.totalorder %s2207_s28, 0 }
  0x5c   : > { %p1942_p2 = scmp.lt.s32.totalorder %s2207_s28, 2  ;;  %p2754_p4 = scmp.eq.s32.totalorder %s2322_s29, 1 }
  0x5d   : > { %s2441_s13 = scalar_select %p36_p13, %s2203_s27, %s38_s30  }
  0x5e   : > { %p47_p1 = por %p46_p12, %p45_p9  ;;  %p2445_p6 = por %p2754_p4, %p45_p9 }
  0x5f   : > { %s413_s22 = sand.u32 1, %s2203_s27   ;;  %s1708_s24 = sshll.u32 %s2207_s28, 7 }
  0x60   : > { %s1707_s23 = sshll.u32 %s413_s22, 3  ;;  %s2756_s0 = sld [smem:[#allocation18_spill]] }
  0x61   : > { %s417_s11 = scalar_lea.vmem [#allocation3], %s1707_s23  ;;  %p2456_p11 = pnand %p1942_p2, %p47_p1 }
  0x62   : > { %s424_s12 = sshll.u32 %s417_s11, 4  ;;  %s414_s21 = scalar_lea.sflag [#allocation4], %s413_s22  ;;  %s2460_s12 = int_to_ptr.vmem [resolvable:$true] %s424_s12 }
  0x63   : > { %p2105_p0 = pneg %p2456_p11 }
  0x66   : > { %s2454_s20 = scalar_lea.hbm %s2756_s0, %s1708_s24  ;;  %s2108_s25 = scalar_lea.hbm %s2756_s0, 256 }
  0x67   : > { %s2103_s30 = scalar_lea.hbm %s2454_s20, 128  ;;  %p2109_p7 = scmp.lt.u32.totalorder %s2454_s20, %s2756_s0 }
  0x68   : > { %p2104_p8 = scmp.ne.s32.totalorder %s2454_s20, %s2103_s30  ;;  %p2110_p10 = scmp.lt.u32.totalorder %s2108_s25, %s2103_s30 }
  0x69   : > { %p2112_p9 = scmp.lt.u32.totalorder %s2103_s30, %s2454_s20 }
  0x6a   : > { %p2106_p3 = pnand %p2105_p0, %p2104_p8  ;;  %p2111_p13 = por %p2110_p10, %p2109_p7 }
  0x6c   : > { %p2107_p5 = pneg %p2106_p3  ;;  %p2113_p12 = por %p2112_p9, %p2111_p13 }
  0x6e   : > { %p2114_p2 = pnand %p2113_p12, %p2107_p5 }
  0x70   : > { %2117 = shalt.err (!%p2114_p2)
}
  0x71   : > { %s2118_s22 = scalar_lea.vmem %s2460_s12, 128  ;;  %s2212_s24 = smov [#allocation3]  }
  0x72   : > { %p2119_p1 = scmp.ne.s32.totalorder %s2460_s12, %s2118_s22  ;;  %s2123_s23 = sshll.u32 %s2212_s24, 4  ;;  %s2124_s23 = int_to_ptr.vmem [resolvable:$false] %s2123_s23 }
  0x73   : > { %s2125_s18 = scalar_lea.vmem %s2124_s23, 256  ;;  %p2126_p3 = scmp.lt.s32.totalorder %s2460_s12, %s2124_s23 }
  0x74   : > { %p2121_p4 = pnand %p2119_p1, %p2105_p0  ;;  %p2127_p7 = scmp.lt.s32.totalorder %s2125_s18, %s2118_s22 }
  0x76   : > { %p2122_p8 = pneg %p2121_p4  ;;  %p2128_p10 = por %p2127_p7, %p2126_p3 }
  0x78   : > { %p2129_p13 = pnand %p2128_p10, %p2122_p8 }
  0x7a   : > { %2132 = shalt.err (!%p2129_p13)
}
  0x7b   : > { %1934 = dma.hbm_to_vmem [thread:$0]  (!%p2456_p11), %s2454_s20, 128, %s2460_s12, %s414_s21  }
  0x7c   : > { %p2758_p5 = scmp.ne.s32.totalorder %s2751_s16, 0 }
  0x7d   : > { %s2490_s30 = sand.u32 (!%p2758_p5), 1, %s2199_s26   ;;  %p2759_p0 = scmp.ne.s32.totalorder (!%p2758_p5), %s2748_s14, 0 }
  0x7e   : > { %433 = sbr.rel (%p2758_p5) target bundleno = 2409 (0x969), region = 72  ;;  %s1710_s25 = sshll.u32 (!%p2758_p5), %s2490_s30, 3 }
  0x7f   : > { %s436_s11 = scalar_lea.sflag (!%p2758_p5), [#allocation4], %s2490_s30  ;;  %s439_s22 = scalar_lea.vmem (!%p2758_p5), [#allocation3], %s1710_s25 }
  0x85   : > { %2178 = dma.done.wait (%p2759_p0), %s436_s11, 128  }
  0x86   : > { %2180 = vsyncadd (%p2759_p0), %s436_s11, 4294967168  ;;  %p2760_p11 = scmp.eq.s32.totalorder %s2322_s29, 0 }
  0x88   : > { %2182 = dma.done.wait (%p2760_p11), [#allocation7], 32   ;;  %p2761_p9 = pmov %p2760_p11 }
  0x8a   : > { %2184 = vsyncadd (%p2761_p9), [#allocation7], 4294967264  ;;  %p2762_p12 = pmov %p2761_p9 }
  0x8b   : > { %p2763_p2 = pmov %p2761_p9 }
  0x8c   : > { %2186 = dma.done.wait (%p2762_p12), [#allocation10], 16  }
  0x8d   : > { %2188 = vsyncadd (%p2763_p2), [#allocation10], 4294967280  ;;  %v2213_v0 = vmov 0.0|0.0   ;;  %vm2214_vm0 = vmmov 0   ;;  %v2215_v1 = vmov 0.0   ;;  %s2764_s1 = sld [smem:[#allocation19_spill]] }
  0x8e   : > { %1875 = vmatprep.subr.bf16.mxu1 %v2213_v0  ;;  %1791 = vmatprep.mubr.msk.f32.mxu1 %vm2214_vm0, %v2215_v1  ;;  %v2527_v8 = vld [vmem:[%s439_s22] sm:$0xff]  ;;  %vm506_vm1 = vcmask 261120   ;;  %v1715_v9 = vld [vmem:[%s2724_s2] ss:$0 sm:$0xff]  ;;  %s2216_s14 = smov 120   ;;  %s2217_s22 = smov 96  }
  0x8f   : > { %1804 = vmatprep.subr.mxu0 %v2215_v1  ;;  %1806 = vmatprep.mubr.msk.f32.mxu0 %vm2214_vm0, %v2215_v1  ;;  %s2218_s16 = smov 80   ;;  %s2219_s20 = smov 88   ;;  %vm583_vm2 = vcmask 64512   ;;  %vm917_vm3 = vcmask 130112   ;;  %vm1089_vm4 = vcmask 195712   ;;  %vm1261_vm5 = vcmask 261312  }
  0x90   : > { %s2220_s12 = smov 72   ;;  %s2221_s15 = smov 112   ;;  %vm1481_vm6 = vcmask 523264  }
  0x91   : > { %s2222_s21 = smov 104   ;;  %s2223_s24 = smov 56  }
  0x92   : > { %s2224_s23 = smov 64   ;;  %s2225_s18 = smov 48  }
  0x93   : > { %v495_v2 = vld [vmem:[%s2764_s1] sm:$0xff]  ;;  %v496_v3 = vld [vmem:[%s2764_s1 + $0x8] sm:$0xff]  ;;  %v497_v4 = vld [vmem:[%s2764_s1 + $0x10] sm:$0xff]  ;;  %s2226_s11 = smov 40   ;;  %s2767_s0 = sld [smem:[#allocation22_spill]] }
  0x94   : > { %v1876_v5 = vpack.c.bf16 %v496_v3, %v495_v2  ;;  %v498_v6 = vld [vmem:[%s2764_s1 + $0x18] sm:$0xff] }
  0x95   : > { %v1879_v7 = vpack.c.bf16 %v498_v6, %v497_v4 }
  0x96   : > { %1877 = vmatpush3.bf16.msra.mxu1 %v1876_v5 }
  0x97   : > { %1878 = vmatprep.subr.bf16.mxu1 %v2213_v0 }
  0x9a   : > { %1880 = vmatpush3.bf16.msra.mxu1 %v1879_v7 }
  0x9b   : > { %1794 = vmatprep.subr.mxu1 %v2215_v1 }
  0x9d   : > { %1792 = vmatmul.mubr.msk.f32.vlgmr.msra.gmra.mrb[0].mxu1 %vm506_vm1, %v2527_v8 }
  0x9e   : > { %1796 = vmatprep.mubr.msk.f32.mxu1 %vm2214_vm0, %v2215_v1 }
 0x170   : > { %v576_v10 = vpop.f32.mrb[0].mxu1 }
 0x171   : > { %v2537_v11 = vadd.f32 %v1715_v9, %v576_v10  ;;  %v1793_v12 = vpop.f32.mrb[1].mxu1 }
 0x173   : > { %747 = vrot.lane.b32.xlu1 %v2537_v11, %s2216_s14  ;;  %581 = vrot.lane.b32.xlu0 %v2537_v11, %s2217_s22  ;;  %s2227_s14 = smov 8   ;;  %s1740_s22 = sshll.u32 %s2322_s29, 7 }
 0x174   : > { %s2677_s1 = scalar_lea.hbm %s2767_s0, %s1740_s22  ;;  %s2230_s29 = smov [#allocation11]  }
 0x177   : > { %921 = vrot.lane.b32.xlu1 %v2537_v11, %s2218_s16  ;;  %749 = vrot.lane.b32.xlu0 %v2537_v11, %s2219_s20  ;;  %s493_s16 = scalar_lea.vmem [#allocation11], %s1710_s25  ;;  %s2137_s25 = sshll.u32 %s2230_s29, 4  ;;  %s2138_s25 = int_to_ptr.vmem [resolvable:$false] %s2137_s25 }
 0x178   : > { %s1602_s20 = sshll.u32 %s493_s16, 4  ;;  %s2679_s20 = int_to_ptr.vmem [resolvable:$true] %s1602_s20 }
 0x179   : > { %p2140_p3 = scmp.lt.s32.totalorder %s2679_s20, %s2138_s25 }
 0x17b   : > { %1093 = vrot.lane.b32.xlu1 %v2537_v11, %s2220_s12  ;;  %919 = vrot.lane.b32.xlu0 %v2537_v11, %s2221_s15 }
 0x17f   : > { %1091 = vrot.lane.b32.xlu0 %v2537_v11, %s2222_s21  ;;  %s1589_s21 = scalar_lea.sflag [#allocation5], %s2490_s30 }
 0x1e5   : > { %v748_v13 = vpop.permute.xlu1 %747  ;;  %v582_v14 = vpop.permute.xlu0 %581 }
 0x1e6   : > { %1795 = vmatpush3.xpose.msk.msra.mxu1 %vm583_vm2, %v582_v14 }
 0x1e7   : > { %1799 = vmatprep.subr.mxu1 %v2215_v1 }
 0x1e9   : > { %1797 = vmatmul.mubr.msk.f32.vlgmr.msra.gmra.mrb[2].mxu1 %vm583_vm2, %v2537_v11  ;;  %v750_v15 = vpop.permute.xlu0 %749  ;;  %v922_v16 = vpop.permute.xlu1 %921 }
 0x1ea   : > { %1805 = vmatpush3.xpose.msk.msra.mxu0 %vm583_vm2, %v750_v15  ;;  %1801 = vmatprep.mubr.msk.f32.mxu1 %vm2214_vm0, %v2215_v1  ;;  %v1264_v15 = vld [vmem:[%s2725_s3] sm:$0xff] }
 0x1eb   : > { %1814 = vmatprep.subr.mxu0 %v2215_v1 }
 0x1ed   : > { %1807 = vmatmul.mubr.msk.f32.vlgmr.msra.gmra.mrb[0].mxu0 %vm583_vm2, %v748_v13  ;;  %v920_v17 = vpop.permute.xlu0 %919  ;;  %v1094_v18 = vpop.permute.xlu1 %1093 }
 0x1ee   : > { %1815 = vmatpush3.xpose.msk.msra.mxu0 %vm583_vm2, %v922_v16  ;;  %1816 = vmatprep.mubr.msk.f32.mxu0 %vm2214_vm0, %v2215_v1  ;;  %v1265_v16 = vld [vmem:[%s2725_s3 + $0x8] sm:$0xff] }
 0x1ef   : > { %1824 = vmatprep.subr.mxu0 %v2215_v1 }
 0x1f1   : > { %1817 = vmatmul.mubr.msk.f32.vlgmr.msra.gmra.mrb[2].mxu0 %vm583_vm2, %v920_v17  ;;  %v1092_v19 = vpop.permute.xlu0 %1091  ;;  %v1882_v17 = vpack.c.bf16 %v1265_v16, %v1264_v15 }
 0x1f2   : > { %1825 = vmatpush3.xpose.msk.msra.mxu0 %vm583_vm2, %v1094_v18  ;;  %1826 = vmatprep.mubr.msk.f32.mxu0 %vm2214_vm0, %v2215_v1  ;;  %v1266_v18 = vld [vmem:[%s2725_s3 + $0x10] sm:$0xff] }
 0x1f3   : > { %1881 = vmatprep.subr.bf16.mxu0 %v2213_v0 }
 0x1f5   : > { %1827 = vmatmul.mubr.msk.f32.vlgmr.msra.gmra.mrb[4].mxu0 %vm583_vm2, %v1092_v19  ;;  %v1267_v19 = vld [vmem:[%s2725_s3 + $0x18] sm:$0xff] }
 0x1f6   : > { %1842 = vmatprep.mubr.msk.f32.mxu0 %vm2214_vm0, %v2215_v1  ;;  %1883 = vmatpush3.bf16.msra.mxu0 %v1882_v17 }
 0x1f7   : > { %1884 = vmatprep.subr.bf16.mxu0 %v2213_v0 }
 0x2bc   : > { %v654_v20 = vpop.f32.mrb[2].mxu1 }
 0x2bd   : > { %v658_v21 = vmul.f32 0.35355338, %v654_v20  ;;  %v1798_v22 = vpop.f32.mrb[3].mxu1  ;;  %v1885_v20 = vpack.c.bf16 %v1267_v19, %v1266_v18 }
 0x2bf   : > { %v659_v23 = vsel %vm583_vm2, %v658_v21, -inf  ;;  %1886 = vmatpush3.bf16.msra.mxu0 %v1885_v20 }
 0x2c0   : > { %v821_v24 = vpop.f32.mrb[0].mxu0  ;;  %660 = vmax.xlane.f32.xlu1 %v659_v23  ;;  %1893 = vmatprep.subr.bf16.mxu0 %v2213_v0 }
 0x2c1   : > { %v825_v25 = vmul.f32 0.35355338, %v821_v24  ;;  %v1808_v26 = vpop.f32.mrb[1].mxu0 }
 0x2c3   : > { %v826_v27 = vsel %vm583_vm2, %v825_v25, -inf }
 0x2c4   : > { %827 = vmax.xlane.f32.xlu0 %v826_v27  ;;  %v993_v28 = vpop.f32.mrb[2].mxu0 }
 0x2c5   : > { %v997_v29 = vmul.f32 0.35355338, %v993_v28  ;;  %v1818_v30 = vpop.f32.mrb[3].mxu0 }
 0x2c7   : > { %v998_v31 = vsel %vm583_vm2, %v997_v29, -inf }
 0x2c8   : > { %999 = vmax.xlane.f32.xlu0 %v998_v31  ;;  %v1165_v32 = vpop.f32.mrb[4].mxu0 }
 0x2c9   : > { %v1169_v33 = vmul.f32 0.35355338, %v1165_v32  ;;  %v1828_v34 = vpop.f32.mrb[5].mxu0 }
 0x2cb   : > { %v1170_v35 = vsel %vm583_vm2, %v1169_v33, -inf }
 0x2cc   : > { %1171 = vmax.xlane.f32.xlu1 %v1170_v35 }
 0x2dd   : > { %837 = vrot.lane.b32.xlu1 %v2537_v11, %s2223_s24  ;;  %s2133_s24 = scalar_lea.vmem %s2679_s20, 128 }
 0x2de   : > { %p2134_p1 = scmp.ne.s32.totalorder %s2679_s20, %s2133_s24 }
 0x2e0   : > { %p2135_p4 = pnand %p2134_p1, %p2445_p6 }
 0x2e2   : > { %p2136_p8 = pneg %p2135_p4 }
 0x34d   : > { %v661_v36 = vpop.xlane.xlu1 %660 }
 0x34e   : > { %v662_v37 = vsub.f32 %v658_v21, %v661_v36 }
 0x350   : > { %v663_v38 = vmul.f32 1.442695, %v662_v37  ;;  %v1382_v37 = vld [vmem:[%s2729_s7 + $0x8] sm:$0xff] }
 0x351   : > { %v828_v39 = vpop.xlane.xlu0 %827 }
 0x352   : > { %1999 = vpow2.f32 %v663_v38  ;;  %v829_v40 = vsub.f32 %v825_v25, %v828_v39  ;;  %v1384_v39 = vld [vmem:[%s2729_s7 + $0x18] sm:$0xff] }
 0x354   : > { %v830_v41 = vmul.f32 1.442695, %v829_v40 }
 0x355   : > { %v1000_v51 = vpop.xlane.xlu0 %999 }
 0x356   : > { %2001 = vpow2.f32 %v830_v41  ;;  %v1001_v52 = vsub.f32 %v997_v29, %v1000_v51  ;;  %v1729_v29 = vld [vmem:[%s2726_s4] ss:$0 sm:$0xff] }
 0x357   : > { %v1466_v41 = vld [vmem:[%s2731_s9] sm:$0xff] }
 0x358   : > { %v1002_v53 = vmul.f32 1.442695, %v1001_v52 }
 0x359   : > { %v1172_v42 = vpop.xlane.xlu1 %1171 }
 0x35a   : > { %v1173_v43 = vsub.f32 %v1169_v33, %v1172_v42  ;;  %v1467_v42 = vld [vmem:[%s2731_s9 + $0x8] sm:$0xff] }
 0x35c   : > { %v2000_v44 = vpop.eup %1999  ;;  %v1174_v45 = vmul.f32 1.442695, %v1173_v43  ;;  %v1468_v43 = vld [vmem:[%s2731_s9 + $0x10] sm:$0xff] }
 0x35d   : > { %v665_v46 = vsel %vm583_vm2, %v2000_v44, 0.0  ;;  %v838_v56 = vpop.permute.xlu1 %837 }
 0x35e   : > { %2003 = vpow2.f32 %v1174_v45  ;;  %666 = vadd.xlane.f32.xlu0 %v665_v46  ;;  %v1469_v45 = vld [vmem:[%s2731_s9 + $0x18] sm:$0xff] }
 0x35f   : > { %2005 = vpow2.f32 %v1002_v53  ;;  %v1897_v46 = vpack.c.bf16 %v1469_v45, %v1468_v43 }
 0x360   : > { %v2002_v47 = vpop.eup %2001 }
 0x361   : > { %v832_v48 = vsel %vm583_vm2, %v2002_v47, 0.0 }
 0x362   : > { %833 = vadd.xlane.f32.xlu1 %v832_v48  ;;  %v1471_v48 = vld [vmem:[%s2731_s9 + $0x28] sm:$0xff] }
 0x368   : > { %v2004_v49 = vpop.eup %2003 }
 0x369   : > { %v1176_v50 = vsel %vm583_vm2, %v2004_v49, 0.0  ;;  %v2006_v54 = vpop.eup %2005 }
 0x36a   : > { %1177 = vadd.xlane.f32.xlu1 %v1176_v50  ;;  %v1004_v55 = vsel %vm583_vm2, %v2006_v54, 0.0 }
 0x374   : > { %670 = vrot.lane.b32.xlu0 %v2537_v11, %s2224_s23  ;;  %s2765_s23 = sld [smem:[#allocation20_spill]] }
 0x37b   : > { %1009 = vrot.lane.b32.xlu1 %v2537_v11, %s2225_s18  ;;  %s2228_s18 = smov 16  }
 0x393   : > { %1005 = vadd.xlane.f32.xlu0 %v1004_v55 }
 0x3a9   : > { %1181 = vrot.lane.b32.xlu0 %v2537_v11, %s2226_s11  ;;  %s2229_s11 = smov 24  }
 0x3eb   : > { %v667_v57 = vpop.xlane.xlu0 %666 }
 0x3ec   : > { %2007 = vrcp.f32 %v667_v57 }
 0x3ef   : > { %v671_v58 = vpop.permute.xlu0 %670  ;;  %v834_v59 = vpop.xlane.xlu1 %833 }
 0x3f0   : > { %2009 = vrcp.f32 %v834_v59  ;;  %1800 = vmatpush3.msra.mxu1 %v671_v58  ;;  %v1731_v59 = vld [vmem:[#allocation6] ss:$0 sm:$0xff] }
 0x3f1   : > { %1809 = vmatprep.subr.mxu1 %v2215_v1 }
 0x3f6   : > { %v2008_v60 = vpop.eup %2007 }
 0x3f7   : > { %v669_v61 = vmul.f32 %v2008_v60, %v2000_v44  ;;  %v1178_v62 = vpop.xlane.xlu1 %1177  ;;  %v1894_v44 = vpack.c.bf16 %v1467_v42, %v1466_v41 }
 0x3f9   : > { %1802 = vmatmul.mubr.msk.f32.vlgmr.msra.gmra.mrb[4].mxu1 %vm583_vm2, %v669_v61  ;;  %v1732_v61 = vld [vmem:[#allocation8] ss:$0 sm:$0xff] }
 0x3fa   : > { %v2010_v63 = vpop.eup %2009  ;;  %1810 = vmatpush3.msra.mxu1 %v838_v56  ;;  %1811 = vmatprep.mubr.msk.f32.mxu1 %vm2214_vm0, %v2215_v1 }
 0x3fb   : > { %v836_v2 = vmul.f32 %v2010_v63, %v2002_v47  ;;  %v1010_v3 = vpop.permute.xlu1 %1009  ;;  %1819 = vmatprep.subr.mxu1 %v2215_v1  ;;  %v1470_v47 = vld [vmem:[%s2731_s9 + $0x20] sm:$0xff] }
 0x3fd   : > { %1812 = vmatmul.mubr.msk.f32.vlgmr.msra.gmra.mrb[6].mxu1 %vm583_vm2, %v836_v2  ;;  %v1473_v2 = vld [vmem:[%s2731_s9 + $0x38] sm:$0xff] }
 0x3fe   : > { %1820 = vmatpush3.msra.mxu1 %v1010_v3  ;;  %1821 = vmatprep.mubr.msk.f32.mxu1 %vm2214_vm0, %v2215_v1 }
 0x3ff   : > { %1829 = vmatprep.subr.mxu1 %v2215_v1 }
 0x420   : > { %v1006_v4 = vpop.xlane.xlu0 %1005 }
 0x421   : > { %2011 = vrcp.f32 %v1006_v4  ;;  %v1733_v4 = vld [vmem:[#allocation9] ss:$0 sm:$0xff] }
 0x422   : > { %2013 = vrcp.f32 %v1178_v62 }
 0x424   : > { %v1182_v9 = vpop.permute.xlu0 %1181 }
 0x42b   : > { %v2012_v5 = vpop.eup %2011 }
 0x42c   : > { %v1008_v6 = vmul.f32 %v2012_v5, %v2006_v54  ;;  %v2014_v7 = vpop.eup %2013 }
 0x42d   : > { %v1180_v10 = vmul.f32 %v2014_v7, %v2004_v49  ;;  %v1900_v49 = vpack.c.bf16 %v1471_v48, %v1470_v47 }
 0x42e   : > { %1822 = vmatmul.mubr.msk.f32.vlgmr.msra.gmra.mrb[8].mxu1 %vm583_vm2, %v1008_v6 }
 0x42f   : > { %1830 = vmatpush3.msra.mxu1 %v1182_v9  ;;  %1831 = vmatprep.mubr.msk.f32.mxu1 %vm2214_vm0, %v2215_v1 }
 0x430   : > { %1887 = vmatprep.subr.bf16.mxu1 %v2213_v0 }
 0x432   : > { %1832 = vmatmul.mubr.msk.f32.vlgmr.msra.gmra.mrb[10].mxu1 %vm583_vm2, %v1180_v10  ;;  %v1735_v10 = vld [vmem:[%s2732_s10] ss:$0 sm:$0xff] }
 0x433   : > { %1853 = vmatprep.mubr.msk.f32.mxu1 %vm2214_vm0, %v2215_v1 }
 0x4cc   : > { %v742_v11 = vpop.f32.mrb[4].mxu1 }
 0x4cd   : > { %746 = vst.msk [vmem:[#allocation2] sm:$0xff] %vm583_vm2, %v742_v11  ;;  %v1803_v12 = vpop.f32.mrb[5].mxu1 }
 0x4d0   : > { %v909_v13 = vpop.f32.mrb[6].mxu1 }
 0x4d1   : > { %914 = vrot.lane.b32.xlu1 %v909_v13, %s2227_s14  ;;  %v1813_v14 = vpop.f32.mrb[7].mxu1  ;;  %s2766_s14 = sld [smem:[#allocation21_spill]] }
 0x501   : > { %v1081_v21 = vpop.f32.mrb[8].mxu1 }
 0x502   : > { %1086 = vrot.lane.b32.xlu0 %v1081_v21, %s2228_s18  ;;  %v1823_v22 = vpop.f32.mrb[9].mxu1 }
 0x505   : > { %v1253_v23 = vpop.f32.mrb[10].mxu1 }
 0x506   : > { %1258 = vrot.lane.b32.xlu1 %v1253_v23, %s2229_s11  ;;  %v1833_v24 = vpop.f32.mrb[11].mxu1 }
 0x543   : > { %v915_v25 = vpop.permute.xlu1 %914 }
 0x544   : > { %918 = vst.msk [vmem:[#allocation2] sm:$0xff] %vm917_vm3, %v915_v25 }
 0x574   : > { %v1087_v26 = vpop.permute.xlu0 %1086 }
 0x575   : > { %1090 = vst.msk [vmem:[#allocation2] sm:$0xff] %vm1089_vm4, %v1087_v26 }
 0x578   : > { %v1259_v27 = vpop.permute.xlu1 %1258 }
 0x579   : > { %1262 = vst.msk [vmem:[#allocation2] sm:$0xff] %vm1261_vm5, %v1259_v27  ;;  %v1737_v27 = vld [vmem:[%s2765_s23] ss:$0 sm:$0xff]  ;;  %s2139_s23 = scalar_lea.vmem %s2138_s25, 256 }
 0x57a   : > { %p2141_p7 = scmp.lt.s32.totalorder %s2139_s23, %s2133_s24 }
 0x57c   : > { %p2142_p10 = por %p2141_p7, %p2140_p3 }
 0x57e   : > { %p2143_p13 = pnand %p2142_p10, %p2136_p8 }
 0x580   : > { %v1263_v28 = vld [vmem:[#allocation2] sm:$0xff] }
 0x581   : > { %1843 = vmatmul.mubr.msk.f32.vlgmr.msra.gmra.mrb[6].mxu0 %vm506_vm1, %v1263_v28 }
 0x582   : > { %1872 = vmatprep.mubr.msk.f32.mxu0 %vm2214_vm0, %v2215_v1  ;;  %v1381_v1 = vld [vmem:[%s2729_s7] sm:$0xff]  ;;  %1895 = vmatpush3.bf16.msra.mxu0 %v1894_v44 }
 0x583   : > { %v1888_v38 = vpack.c.bf16 %v1382_v37, %v1381_v1  ;;  %1896 = vmatprep.subr.bf16.mxu0 %v2213_v0 }
 0x585   : > { %1889 = vmatpush3.bf16.msra.mxu1 %v1888_v38 }
 0x586   : > { %1890 = vmatprep.subr.bf16.mxu1 %v2213_v0  ;;  %1898 = vmatpush3.bf16.msra.mxu0 %v1897_v46 }
 0x587   : > { %1899 = vmatprep.subr.bf16.mxu0 %v2213_v0 }
 0x58a   : > { %1901 = vmatpush3.bf16.msra.mxu0 %v1900_v49 }
 0x58b   : > { %1902 = vmatprep.subr.bf16.mxu0 %v2213_v0  ;;  %v1472_v0 = vld [vmem:[%s2731_s9 + $0x30] sm:$0xff] }
 0x58c   : > { %v1903_v3 = vpack.c.bf16 %v1473_v2, %v1472_v0 }
 0x58e   : > { %1904 = vmatpush3.bf16.msra.mxu0 %v1903_v3 }
 0x654   : > { %v1344_v30 = vpop.f32.mrb[6].mxu0 }
 0x655   : > { %v1345_v31 = vadd.f32 %v1729_v29, %v1344_v30  ;;  %v1844_v32 = vpop.f32.mrb[7].mxu0  ;;  %v1738_v29 = vld [vmem:[%s2766_s14] ss:$0 sm:$0xff] }
 0x657   : > { %v1348_v33 = vadd.f32 %v1345_v31, %v2527_v8  ;;  %v1383_v8 = vld [vmem:[%s2729_s7 + $0x10] sm:$0xff] }
 0x658   : > { %v1891_v40 = vpack.c.bf16 %v1384_v39, %v1383_v8 }
 0x659   : > { %v1349_v34 = vsel %vm506_vm1, %v1348_v33, 0.0  ;;  %v1354_v35 = vmul.f32 %v1348_v33, %v1348_v33 }
 0x65a   : > { %1350 = vadd.xlane.f32.xlu0 %v1349_v34  ;;  %1892 = vmatpush3.bf16.msra.mxu1 %v1891_v40 }
 0x65b   : > { %v1355_v36 = vsel %vm506_vm1, %v1354_v35, 0.0 }
 0x65c   : > { %1356 = vadd.xlane.f32.xlu1 %v1355_v36 }
 0x6e7   : > { %v1351_v50 = vpop.xlane.xlu0 %1350 }
 0x6e8   : > { %v1353_v51 = vmul.f32 0.03125, %v1351_v50 }
 0x6e9   : > { %v1357_v52 = vpop.xlane.xlu1 %1356 }
 0x6ea   : > { %v1359_v53 = vmul.f32 %v1353_v51, %v1353_v51  ;;  %v1358_v54 = vmul.f32 0.03125, %v1357_v52  ;;  %v1361_v57 = vsub.f32 %v1348_v33, %v1353_v51 }
 0x6ec   : > { %v1360_v55 = vsub.f32 %v1358_v54, %v1359_v53 }
 0x6ee   : > { %v1362_v56 = vadd.f32 1e-05, %v1360_v55 }
 0x6f0   : > { %2015 = vrsqrt.f32 %v1362_v56 }
 0x6fa   : > { %v2016_v58 = vpop.eup %2015 }
 0x6fb   : > { %v1364_v60 = vmul.f32 %v2016_v58, %v1361_v57 }
 0x6fd   : > { %v1372_v62 = vmul.f32 %v1731_v59, %v1364_v60 }
 0x6ff   : > { %v1380_v63 = vadd.f32 %v1732_v61, %v1372_v62 }
 0x701   : > { %1854 = vmatmul.mubr.msk.f32.vlgmr.msra.gmra.mrb[12].mxu1 %vm506_vm1, %v1380_v63 }
 0x7d4   : > { %v1461_v5 = vpop.f32.mrb[12].mxu1 }
 0x7d5   : > { %v1462_v6 = vadd.f32 %v1733_v4, %v1461_v5  ;;  %v1855_v7 = vpop.f32.mrb[13].mxu1 }
 0x7d7   : > { %v1465_v9 = vmax.f32 %v1462_v6, 0.0 }
 0x7d9   : > { %1873 = vmatmul.mubr.msk.f32.vlgmr.msra.gmra.mrb[8].mxu0 %vm1481_vm6, %v1465_v9 }
 0x8ac   : > { %v1551_v11 = vpop.f32.mrb[8].mxu0 }
 0x8ad   : > { %v1552_v12 = vadd.f32 %v1735_v10, %v1551_v11  ;;  %v1874_v13 = vpop.f32.mrb[9].mxu0 }
 0x8af   : > { %v1555_v14 = vadd.f32 %v1552_v12, %v1380_v63 }
 0x8b1   : > { %v1556_v15 = vsel %vm506_vm1, %v1555_v14, 0.0  ;;  %v1560_v16 = vmul.f32 %v1555_v14, %v1555_v14 }
 0x8b2   : > { %1557 = vadd.xlane.f32.xlu0 %v1556_v15 }
 0x8b3   : > { %v1561_v17 = vsel %vm506_vm1, %v1560_v16, 0.0 }
 0x8b6   : > { %1562 = vadd.xlane.f32.xlu0 %v1561_v17 }
 0x93f   : > { %v1558_v18 = vpop.xlane.xlu0 %1557 }
 0x940   : > { %v1559_v19 = vmul.f32 0.03125, %v1558_v18 }
 0x942   : > { %v1565_v21 = vmul.f32 %v1559_v19, %v1559_v19  ;;  %v1567_v25 = vsub.f32 %v1555_v14, %v1559_v19 }
 0x943   : > { %v1563_v20 = vpop.xlane.xlu0 %1562 }
 0x944   : > { %v1564_v22 = vmul.f32 0.03125, %v1563_v20 }
 0x946   : > { %v1566_v23 = vsub.f32 %v1564_v22, %v1565_v21 }
 0x948   : > { %v1568_v24 = vadd.f32 1e-05, %v1566_v23 }
 0x94a   : > { %2017 = vrsqrt.f32 %v1568_v24 }
 0x954   : > { %v2018_v26 = vpop.eup %2017 }
 0x955   : > { %v1570_v28 = vmul.f32 %v2018_v26, %v1567_v25 }
 0x957   : > { %v1578_v30 = vmul.f32 %v1737_v27, %v1570_v28 }
 0x959   : > { %v1586_v31 = vadd.f32 %v1738_v29, %v1578_v30 }
 0x95b   : > { %1587 = vst.msk [vmem:[%s493_s16] sm:$0xff] %vm506_vm1, %v1586_v31 }
 0x95c   : > { %2146 = shalt.err (!%p2143_p13)
}
 0x95d   : > { %s2147_s30 = scalar_lea.hbm %s2677_s1, 128  ;;  %s2151_s14 = scalar_lea.hbm %s2767_s0, 256 }
 0x95e   : > { %p2148_p5 = scmp.ne.s32.totalorder %s2677_s1, %s2147_s30  ;;  %p2152_p9 = scmp.lt.u32.totalorder %s2677_s1, %s2767_s0 }
 0x95f   : > { %p2153_p12 = scmp.lt.u32.totalorder %s2151_s14, %s2147_s30  ;;  %p2155_p1 = scmp.lt.u32.totalorder %s2147_s30, %s2677_s1 }
 0x960   : > { %p2149_p0 = pnand %p2148_p5, %p2445_p6 }
 0x961   : > { %p2154_p2 = por %p2153_p12, %p2152_p9 }
 0x962   : > { %p2150_p11 = pneg %p2149_p0 }
 0x963   : > { %p2156_p4 = por %p2155_p1, %p2154_p2 }
 0x965   : > { %p2157_p8 = pnand %p2156_p4, %p2150_p11 }
 0x967   : > { %2160 = shalt.err (!%p2157_p8)
}
 0x968   : > { %1919 = dma.vmem_to_hbm [thread:$0]  (%p2445_p6), %s2679_s20, 128, %s2677_s1, %s1589_s21  }
 0x969 PF: > { %s2768_s12 = sld [smem:[#allocation16_spill]]  ;;  %s2769_s15 = sld [smem:[#allocation17_spill]] }
 0x96a   : > { %p2771_p7 = scmp.ge.s32.totalorder %s2207_s28, 2 }
 0x96f   : > { %s1614_s24 = sand.u32 1, %s2768_s12   ;;  %p2770_p3 = scmp.ne.s32.totalorder %s2769_s15, 0 }
 0x970   : > { %s1615_s29 = scalar_lea.sflag [#allocation5], %s1614_s24 }
 0x971   : > { %p1936_p10 = pnand %p2771_p7, %p2770_p3 }
 0x973   : > { %2190 = dma.done.wait (!%p1936_p10), %s1615_s29, 128  }
 0x974   : > { %2192 = vsyncadd (!%p1936_p10), %s1615_s29, 4294967168  ;;  %p28_p13 = scmp.ge.s32.totalorder %s2431_s19, 4   ;;  %s2772_s25 = smov %s2199_s26 }
 0x975   : > { %s2773_s26 = smov %s2203_s27  ;;  %s2774_s27 = smov %s2441_s13 }
 0x976   : > { %s2775_s28 = smov %s2431_s19  ;;  %30 = sbr.rel (!%p28_p13) target bundleno = 13 (0xd), region = 129 }
 0x97d   :  { %1620 = vsyncpa [#allocation4], 1 }
 0x97e   :  { %1622 = vsyncpa [#allocation4 + $0x1], 1 }
 0x97f   :  { %1623 = vsyncpa [#allocation7], 1 }
 0x980   :  { %1624 = vsyncpa [#allocation10], 1 }
 0x981   :  { %1625 = vsyncpa [#allocation5], 1 }
 0x982   :  { %1627 = vsyncpa [#allocation5 + $0x1], 1 }

</bundles_post_ra>
